<compile_context>
chip_gen: v5e
topology: v5e:2x2
jax: 0.10.0
libtpu: 0.0.40
codegen_flags: <defaults>
</compile_context>

<pallas_src>
import functools

import numpy as np
import jax
import jax.numpy as jnp
from jax.experimental import pallas as pl
from jax.experimental.pallas import tpu as pltpu

KSIZE = 5        # 5x5 convs
PAD = 2          # "same" padding for 5x5
CIN_PAD = 8      # conv1 input channels padded to 8 (packed with w into lanes)
C1_PAD = 8       # conv1 output channels padded to 8 (packed with w into lanes)
C2 = 16          # conv2 output channels (packed with w into lanes)
FC_LANES = 128   # fc hidden dims padded to 128 lanes


# --------------------------------- kernel -----------------------------------

def _lenet5_kernel(x_ref, w1_ref, b1_ref, w2_ref, b2_ref,
                   wf1_ref, bf1_ref, wf2_ref, bf2_ref, wf3_ref, bf3_ref,
                   out_ref, a1_ref, c2in_ref, a2_ref, *, B, H, W):
    """One batch block: conv1 -> pool -> conv2 -> pool -> fc1 -> fc2 -> fc3."""
    f32, bf16 = jnp.float32, jnp.bfloat16
    H2, H4 = H // 2, H // 4
    L = C1_PAD * W                      # lane count of conv1/conv2 io (= 8*W)

    # ---- conv1 + bias + ReLU: 5 banded matmuls (kw, cin folded into K) ----
    acc1 = None
    for kh in range(KSIZE):
        lhs = x_ref[:, kh:kh + H, :].reshape(B * H, L)          # bf16, lane-dense
        d = jnp.dot(lhs, w1_ref[kh], preferred_element_type=f32)
        acc1 = d if acc1 is None else acc1 + d
    a1_ref[...] = jnp.maximum(acc1 + b1_ref[...], 0.0).reshape(B, H, L)
    # a1 lane layout: 8*w + cout

    # ---- 2x2 max pool #1 (rows via strided sublane reads, cols via lane shift)
    hp1 = jnp.maximum(a1_ref[:, pl.ds(0, H2, 2), :],
                      a1_ref[:, pl.ds(1, H2, 2), :])             # (B, H/2, L)
    p1 = jnp.maximum(hp1[:, :, :L - C1_PAD], hp1[:, :, C1_PAD:])  # (B, H/2, L-8)
    # p1 lane layout: 16*w' + cout (odd-group lanes are garbage -> zero W2 rows)

    # ---- conv2 input with zero h/w halo (re-zeroed every step: megacore-safe)
    c2in_ref[...] = jnp.zeros(c2in_ref.shape, c2in_ref.dtype)
    c2in_ref[:, PAD:PAD + H2, :L - C1_PAD] = p1.astype(bf16)

    # ---- conv2 + bias + ReLU ----
    acc2 = None
    for kh in range(KSIZE):
        lhs = c2in_ref[:, kh:kh + H2, :].reshape(B * H2, L)
        d = jnp.dot(lhs, w2_ref[kh], preferred_element_type=f32)
        acc2 = d if acc2 is None else acc2 + d
    a2_ref[...] = jnp.maximum(acc2 + b2_ref[...], 0.0).reshape(B, H2, L)
    # a2 lane layout: 16*w + cout

    # ---- 2x2 max pool #2 ----
    hp2 = jnp.maximum(a2_ref[:, pl.ds(0, H4, 2), :],
                      a2_ref[:, pl.ds(1, H4, 2), :])             # (B, H/4, L)
    p2 = jnp.maximum(hp2[:, :, :L - C2], hp2[:, :, C2:])          # (B, H/4, L-16)
    p2 = jnp.concatenate([p2, jnp.zeros((B, H4, C2), p2.dtype)], axis=-1)
    p2 = p2.astype(bf16)                                          # (B, H/4, L)
    # p2 lane layout: 32*w' + cout (garbage lanes hit zero fc1 weight rows)

    # ---- fc1 + ReLU: sum over the pooled rows (compact K, no flatten relayout)
    accf = None
    for h in range(H4):
        d = jnp.dot(p2[:, h, :], wf1_ref[h], preferred_element_type=f32)
        accf = d if accf is None else accf + d
    h1 = jnp.maximum(accf + bf1_ref[...], 0.0).astype(bf16)       # (B, 128)

    # ---- fc2 + ReLU, fc3 ----
    h2 = jnp.dot(h1, wf2_ref[...], preferred_element_type=f32) + bf2_ref[...]
    h2 = jnp.maximum(h2, 0.0).astype(bf16)
    out_ref[...] = jnp.dot(h2, wf3_ref[...], preferred_element_type=f32) + bf3_ref[...]


# --------------------------------- wrapper ----------------------------------

def lenet5_forward(packed, x, n_classes, *, block_b=8):
    """x: (N, Cin, H, W) f32 NCHW -> logits (N, n_classes)."""
    N, Cin, H, W = x.shape
    if H % 4 or W % 4:
        raise ValueError("H and W must be divisible by 4")
    if Cin > CIN_PAD:
        raise ValueError(f"in_channels must be <= {CIN_PAD}")
    L = C1_PAD * W

    B = block_b if N >= block_b else N
    n_blocks = -(-N // B)
    N_pad = n_blocks * B

    # One-time cheap layout prep: NCHW -> rows (n, h+2 with zero halo),
    # lanes = 8*w + cin (lane-dense), bf16.
    xt = jnp.transpose(x, (0, 2, 3, 1))                              # (N,H,W,Cin)
    xt = jnp.pad(xt, ((0, N_pad - N), (0, 0), (0, 0), (0, CIN_PAD - Cin)))
    xt = xt.reshape(N_pad, H, L)
    xt = jnp.pad(xt, ((0, 0), (PAD, PAD), (0, 0))).astype(jnp.bfloat16)

    kernel = functools.partial(_lenet5_kernel, B=B, H=H, W=W)
    out = pl.pallas_call(
        kernel,
        out_shape=jax.ShapeDtypeStruct((N_pad, FC_LANES), jnp.float32),
        grid=(n_blocks,),
        in_specs=[
            pl.BlockSpec((B, H + 2 * PAD, L), lambda n: (n, 0, 0)),   # x block
            pl.BlockSpec((KSIZE, L, L), lambda n: (0, 0, 0)),         # conv1 W
            pl.BlockSpec((1, L), lambda n: (0, 0)),                   # conv1 b
            pl.BlockSpec((KSIZE, L, L), lambda n: (0, 0, 0)),         # conv2 W
            pl.BlockSpec((1, L), lambda n: (0, 0)),                   # conv2 b
            pl.BlockSpec((H // 4, L, FC_LANES), lambda n: (0, 0, 0)), # fc1 W
            pl.BlockSpec((1, FC_LANES), lambda n: (0, 0)),            # fc1 b
            pl.BlockSpec((FC_LANES, FC_LANES), lambda n: (0, 0)),     # fc2 W
            pl.BlockSpec((1, FC_LANES), lambda n: (0, 0)),            # fc2 b
            pl.BlockSpec((FC_LANES, FC_LANES), lambda n: (0, 0)),     # fc3 W
            pl.BlockSpec((1, FC_LANES), lambda n: (0, 0)),            # fc3 b
        ],
        out_specs=pl.BlockSpec((B, FC_LANES), lambda n: (n, 0)),
        scratch_shapes=[
            pltpu.VMEM((B, H, L), jnp.float32),                       # conv1 acts
            pltpu.VMEM((B, H // 2 + 2 * PAD, L), jnp.bfloat16),       # conv2 input
            pltpu.VMEM((B, H // 2, L), jnp.float32),                  # conv2 acts
        ],
        compiler_params=pltpu.CompilerParams(
            dimension_semantics=("parallel",),
            vmem_limit_bytes=32 * 1024 * 1024),
    )(xt, packed["w1"], packed["b1"], packed["w2"], packed["b2"],
      packed["wf1"], packed["bf1"], packed["wf2"], packed["bf2"],
      packed["wf3"], packed["bf3"])
    return out[:N, :n_classes]


# ------------------------- params: init + one-time packing -------------------

def init_params(key, in_channels, n_classes, data_shape):
    """Deterministic synthetic weights (PyTorch-style uniform fan-in init)."""
    H, W = data_shape
    ks = jax.random.split(key, 10)

    def u(k, shape, fan_in):
        bound = 1.0 / float(fan_in) ** 0.5
        return jax.random.uniform(k, shape, jnp.float32, -bound, bound)

    f1_in = (H // 4) * (W // 4) * 16
    return {
        "conv1_w": u(ks[0], (6, in_channels, 5, 5), in_channels * 25),
        "conv1_b": u(ks[1], (6,), in_channels * 25),
        "conv2_w": u(ks[2], (16, 6, 5, 5), 6 * 25),
        "conv2_b": u(ks[3], (16,), 6 * 25),
        "fc1_w": u(ks[4], (120, f1_in), f1_in),
        "fc1_b": u(ks[5], (120,), f1_in),
        "fc2_w": u(ks[6], (84, 120), 120),
        "fc2_b": u(ks[7], (84,), 120),
        "fc3_w": u(ks[8], (n_classes, 84), 84),
        "fc3_b": u(ks[9], (n_classes,), 84),
    }


def pack_params(p, in_channels, n_classes, data_shape):
    """One-time numpy packing: banded per-kh conv matrices, permuted fc weights."""
    H, W = data_shape
    H4, W4, W2c = H // 4, W // 4, W // 2
    L = C1_PAD * W
    p = {k: np.asarray(v, np.float32) for k, v in p.items()}

    # conv1: rows = lane(8*w_in + cin) of the packed input, cols = lane(8*w_out + cout)
    w1 = np.zeros((KSIZE, L, L), np.float32)
    for kh in range(KSIZE):
        for kw in range(KSIZE):
            tap = p["conv1_w"][:, :, kh, kw].T                     # (cin, cout)
            for wo in range(W):
                wi = wo + kw - PAD
                if 0 <= wi < W:
                    w1[kh, 8 * wi:8 * wi + in_channels, 8 * wo:8 * wo + 6] = tap
    b1 = np.zeros((1, L), np.float32)
    for wo in range(W):
        b1[0, 8 * wo:8 * wo + 6] = p["conv1_b"]

    # conv2: rows = lane(16*w_in + c) of the pooled conv1 map, cols = lane(16*w_out + cout)
    w2 = np.zeros((KSIZE, L, L), np.float32)
    for kh in range(KSIZE):
        for kw in range(KSIZE):
            tap = p["conv2_w"][:, :, kh, kw].T                     # (6, 16)
            for wo in range(W2c):
                wi = wo + kw - PAD
                if 0 <= wi < W2c:
                    w2[kh, 16 * wi:16 * wi + 6, 16 * wo:16 * wo + 16] = tap
    b2 = np.zeros((1, L), np.float32)
    for wo in range(W2c):
        b2[0, 16 * wo:16 * wo + 16] = p["conv2_b"]

    # fc1: one (L, 128) matrix per pooled row h; rows = lane(32*w + c) of the pooled
    # conv2 map; absorbs torch's NCHW flatten order (c*H4*W4 + h*W4 + w).
    wf1 = np.zeros((H4, L, FC_LANES), np.float32)
    for h in range(H4):
        for w in range(W4):
            for c in range(C2):
                wf1[h, 32 * w + c, :120] = p["fc1_w"][:, c * H4 * W4 + h * W4 + w]
    bf1 = np.zeros((1, FC_LANES), np.float32)
    bf1[0, :120] = p["fc1_b"]

    wf2 = np.zeros((FC_LANES, FC_LANES), np.float32)
    wf2[:120, :84] = p["fc2_w"].T
    bf2 = np.zeros((1, FC_LANES), np.float32)
    bf2[0, :84] = p["fc2_b"]

    wf3 = np.zeros((FC_LANES, FC_LANES), np.float32)
    wf3[:84, :n_classes] = p["fc3_w"].T
    bf3 = np.zeros((1, FC_LANES), np.float32)
    bf3[0, :n_classes] = p["fc3_b"]

    bf = jnp.bfloat16
    return {
        "w1": jnp.asarray(w1, bf), "b1": jnp.asarray(b1, jnp.float32),
        "w2": jnp.asarray(w2, bf), "b2": jnp.asarray(b2, jnp.float32),
        "wf1": jnp.asarray(wf1, bf), "bf1": jnp.asarray(bf1, jnp.float32),
        "wf2": jnp.asarray(wf2, bf), "bf2": jnp.asarray(bf2, jnp.float32),
        "wf3": jnp.asarray(wf3, bf), "bf3": jnp.asarray(bf3, jnp.float32),
    }


# ------------------------------ pure-JAX reference ---------------------------

def lenet5_reference(p, x):
    y = jax.lax.conv_general_dilated(
        x, p["conv1_w"], window_strides=(1, 1), padding=((PAD, PAD), (PAD, PAD)),
        dimension_numbers=("NCHW", "OIHW", "NCHW"))
    y = jax.nn.relu(y + p["conv1_b"][None, :, None, None])
    y = jax.lax.reduce_window(y, -jnp.inf, jax.lax.max, (1, 1, 2, 2), (1, 1, 2, 2), "VALID")
    y = jax.lax.conv_general_dilated(
        y, p["conv2_w"], window_strides=(1, 1), padding=((PAD, PAD), (PAD, PAD)),
        dimension_numbers=("NCHW", "OIHW", "NCHW"))
    y = jax.nn.relu(y + p["conv2_b"][None, :, None, None])
    y = jax.lax.reduce_window(y, -jnp.inf, jax.lax.max, (1, 1, 2, 2), (1, 1, 2, 2), "VALID")
    y = y.reshape(y.shape[0], -1)
    y = jax.nn.relu(y @ p["fc1_w"].T + p["fc1_b"])
    y = jax.nn.relu(y @ p["fc2_w"].T + p["fc2_b"])
    return y @ p["fc3_w"].T + p["fc3_b"]


# ----------------------------------- main ------------------------------------

if __name__ == "__main__":
    key = jax.random.PRNGKey(0)
    kp, kx = jax.random.split(key)

    in_channels = 4
    n_classes = 10
    data_shape = (16, 16)
    batch = 2

    params = init_params(kp, in_channels, n_classes, data_shape)
    packed = pack_params(params, in_channels, n_classes, data_shape)
    x = jax.random.normal(kx, (batch, in_channels, *data_shape), jnp.float32)

    fwd = jax.jit(functools.partial(lenet5_forward, n_classes=n_classes))
    out = jax.block_until_ready(fwd(packed, x))

    assert out.shape == (batch, n_classes)
    assert bool(jnp.all(jnp.isfinite(out)))

    ref = jax.block_until_ready(lenet5_reference(params, x))
    assert bool(jnp.allclose(out, ref, rtol=0.1, atol=0.1)), "mismatch vs reference"

    print("KERNEL_OK")
</pallas_src>

<mosaic_0001>
module attributes {stable_mosaic.version = 11 : i64} {
  func.func @_lenet5_kernel(%arg0: i32, %arg1: memref<2x20x128xbf16, #tpu.memory_space<vmem>>, %arg2: memref<5x128x128xbf16, #tpu.memory_space<vmem>>, %arg3: memref<1x128xf32, #tpu.memory_space<vmem>>, %arg4: memref<5x128x128xbf16, #tpu.memory_space<vmem>>, %arg5: memref<1x128xf32, #tpu.memory_space<vmem>>, %arg6: memref<4x128x128xbf16, #tpu.memory_space<vmem>>, %arg7: memref<1x128xf32, #tpu.memory_space<vmem>>, %arg8: memref<128x128xbf16, #tpu.memory_space<vmem>>, %arg9: memref<1x128xf32, #tpu.memory_space<vmem>>, %arg10: memref<128x128xbf16, #tpu.memory_space<vmem>>, %arg11: memref<1x128xf32, #tpu.memory_space<vmem>>, %arg12: memref<2x128xf32, #tpu.memory_space<vmem>>, %arg13: memref<2x16x128xf32, #tpu.memory_space<vmem>>, %arg14: memref<2x12x128xbf16, #tpu.memory_space<vmem>>, %arg15: memref<2x8x128xf32, #tpu.memory_space<vmem>>) attributes {dimension_semantics = [#tpu.dimension_semantics<parallel>], iteration_bounds = array<i64: 1>, scalar_prefetch = 0 : i64, scratch_operands = 3 : i64, tpu.core_type = #tpu.core_type<tc>, window_params = [{transform_indices = @transform_0, window_bounds = array<i64: 2, 20, 128>}, {pipeline_mode = #tpu.pipeline_mode<synchronous>, transform_indices = @transform_1, window_bounds = array<i64: 5, 128, 128>}, {pipeline_mode = #tpu.pipeline_mode<synchronous>, transform_indices = @transform_2, window_bounds = array<i64: 1, 128>}, {pipeline_mode = #tpu.pipeline_mode<synchronous>, transform_indices = @transform_3, window_bounds = array<i64: 5, 128, 128>}, {pipeline_mode = #tpu.pipeline_mode<synchronous>, transform_indices = @transform_4, window_bounds = array<i64: 1, 128>}, {pipeline_mode = #tpu.pipeline_mode<synchronous>, transform_indices = @transform_5, window_bounds = array<i64: 4, 128, 128>}, {pipeline_mode = #tpu.pipeline_mode<synchronous>, transform_indices = @transform_6, window_bounds = array<i64: 1, 128>}, {pipeline_mode = #tpu.pipeline_mode<synchronous>, transform_indices = @transform_7, window_bounds = array<i64: 128, 128>}, {pipeline_mode = #tpu.pipeline_mode<synchronous>, transform_indices = @transform_8, window_bounds = array<i64: 1, 128>}, {pipeline_mode = #tpu.pipeline_mode<synchronous>, transform_indices = @transform_9, window_bounds = array<i64: 128, 128>}, {pipeline_mode = #tpu.pipeline_mode<synchronous>, transform_indices = @transform_10, window_bounds = array<i64: 1, 128>}, {transform_indices = @transform_11, window_bounds = array<i64: 2, 128>}]} {
    %c0 = arith.constant 0 : index
    %c0_0 = arith.constant 0 : index
    %c0_1 = arith.constant 0 : index
    %0 = vector.load %arg1[%c0, %c0_0, %c0_1] : memref<2x20x128xbf16, #tpu.memory_space<vmem>>, vector<2x16x128xbf16>
    %1 = vector.shape_cast %0 : vector<2x16x128xbf16> to vector<32x128xbf16>
    %c0_2 = arith.constant 0 : index
    %c0_3 = arith.constant 0 : index
    %c0_4 = arith.constant 0 : index
    %2 = vector.load %arg2[%c0_2, %c0_3, %c0_4] : memref<5x128x128xbf16, #tpu.memory_space<vmem>>, vector<1x128x128xbf16>
    %3 = vector.shape_cast %2 : vector<1x128x128xbf16> to vector<128x128xbf16>
    %cst = arith.constant dense<0.000000e+00> : vector<32x128xf32>
    %4 = tpu.matmul %1, %3, %cst {dimension_numbers = #tpu.dot_dimension_numbers<[1], [0], [0], [1], [0, 0, 1, 1], [], []>} : vector<32x128xbf16>, vector<128x128xbf16>, vector<32x128xf32> -> vector<32x128xf32>
    %c0_5 = arith.constant 0 : index
    %c1 = arith.constant 1 : index
    %c0_6 = arith.constant 0 : index
    %5 = vector.load %arg1[%c0_5, %c1, %c0_6] : memref<2x20x128xbf16, #tpu.memory_space<vmem>>, vector<2x16x128xbf16>
    %6 = vector.shape_cast %5 : vector<2x16x128xbf16> to vector<32x128xbf16>
    %c1_7 = arith.constant 1 : index
    %c0_8 = arith.constant 0 : index
    %c0_9 = arith.constant 0 : index
    %7 = vector.load %arg2[%c1_7, %c0_8, %c0_9] : memref<5x128x128xbf16, #tpu.memory_space<vmem>>, vector<1x128x128xbf16>
    %8 = vector.shape_cast %7 : vector<1x128x128xbf16> to vector<128x128xbf16>
    %cst_10 = arith.constant dense<0.000000e+00> : vector<32x128xf32>
    %9 = tpu.matmul %6, %8, %cst_10 {dimension_numbers = #tpu.dot_dimension_numbers<[1], [0], [0], [1], [0, 0, 1, 1], [], []>} : vector<32x128xbf16>, vector<128x128xbf16>, vector<32x128xf32> -> vector<32x128xf32>
    %10 = arith.addf %4, %9 : vector<32x128xf32>
    %c0_11 = arith.constant 0 : index
    %c2 = arith.constant 2 : index
    %c0_12 = arith.constant 0 : index
    %11 = vector.load %arg1[%c0_11, %c2, %c0_12] : memref<2x20x128xbf16, #tpu.memory_space<vmem>>, vector<2x16x128xbf16>
    %12 = vector.shape_cast %11 : vector<2x16x128xbf16> to vector<32x128xbf16>
    %c2_13 = arith.constant 2 : index
    %c0_14 = arith.constant 0 : index
    %c0_15 = arith.constant 0 : index
    %13 = vector.load %arg2[%c2_13, %c0_14, %c0_15] : memref<5x128x128xbf16, #tpu.memory_space<vmem>>, vector<1x128x128xbf16>
    %14 = vector.shape_cast %13 : vector<1x128x128xbf16> to vector<128x128xbf16>
    %cst_16 = arith.constant dense<0.000000e+00> : vector<32x128xf32>
    %15 = tpu.matmul %12, %14, %cst_16 {dimension_numbers = #tpu.dot_dimension_numbers<[1], [0], [0], [1], [0, 0, 1, 1], [], []>} : vector<32x128xbf16>, vector<128x128xbf16>, vector<32x128xf32> -> vector<32x128xf32>
    %16 = arith.addf %10, %15 : vector<32x128xf32>
    %c0_17 = arith.constant 0 : index
    %c3 = arith.constant 3 : index
    %c0_18 = arith.constant 0 : index
    %17 = vector.load %arg1[%c0_17, %c3, %c0_18] : memref<2x20x128xbf16, #tpu.memory_space<vmem>>, vector<2x16x128xbf16>
    %18 = vector.shape_cast %17 : vector<2x16x128xbf16> to vector<32x128xbf16>
    %c3_19 = arith.constant 3 : index
    %c0_20 = arith.constant 0 : index
    %c0_21 = arith.constant 0 : index
    %19 = vector.load %arg2[%c3_19, %c0_20, %c0_21] : memref<5x128x128xbf16, #tpu.memory_space<vmem>>, vector<1x128x128xbf16>
    %20 = vector.shape_cast %19 : vector<1x128x128xbf16> to vector<128x128xbf16>
    %cst_22 = arith.constant dense<0.000000e+00> : vector<32x128xf32>
    %21 = tpu.matmul %18, %20, %cst_22 {dimension_numbers = #tpu.dot_dimension_numbers<[1], [0], [0], [1], [0, 0, 1, 1], [], []>} : vector<32x128xbf16>, vector<128x128xbf16>, vector<32x128xf32> -> vector<32x128xf32>
    %22 = arith.addf %16, %21 : vector<32x128xf32>
    %c0_23 = arith.constant 0 : index
    %c4 = arith.constant 4 : index
    %c0_24 = arith.constant 0 : index
    %23 = vector.load %arg1[%c0_23, %c4, %c0_24] : memref<2x20x128xbf16, #tpu.memory_space<vmem>>, vector<2x16x128xbf16>
    %24 = vector.shape_cast %23 : vector<2x16x128xbf16> to vector<32x128xbf16>
    %c4_25 = arith.constant 4 : index
    %c0_26 = arith.constant 0 : index
    %c0_27 = arith.constant 0 : index
    %25 = vector.load %arg2[%c4_25, %c0_26, %c0_27] : memref<5x128x128xbf16, #tpu.memory_space<vmem>>, vector<1x128x128xbf16>
    %26 = vector.shape_cast %25 : vector<1x128x128xbf16> to vector<128x128xbf16>
    %cst_28 = arith.constant dense<0.000000e+00> : vector<32x128xf32>
    %27 = tpu.matmul %24, %26, %cst_28 {dimension_numbers = #tpu.dot_dimension_numbers<[1], [0], [0], [1], [0, 0, 1, 1], [], []>} : vector<32x128xbf16>, vector<128x128xbf16>, vector<32x128xf32> -> vector<32x128xf32>
    %28 = arith.addf %22, %27 : vector<32x128xf32>
    %c0_29 = arith.constant 0 : index
    %c0_30 = arith.constant 0 : index
    %29 = vector.load %arg3[%c0_29, %c0_30] : memref<1x128xf32, #tpu.memory_space<vmem>>, vector<1x128xf32>
    %30 = vector.broadcast %29 : vector<1x128xf32> to vector<32x128xf32>
    %31 = arith.addf %28, %30 : vector<32x128xf32>
    %cst_31 = arith.constant 0.000000e+00 : f32
    %32 = vector.broadcast %cst_31 : f32 to vector<32x128xf32>
    %33 = arith.maximumf %31, %32 : vector<32x128xf32>
    %34 = vector.shape_cast %33 : vector<32x128xf32> to vector<2x16x128xf32>
    %c0_32 = arith.constant 0 : index
    %c0_33 = arith.constant 0 : index
    %c0_34 = arith.constant 0 : index
    %35 = vector.load %arg13[%c0_32, %c0_33, %c0_34] : memref<2x16x128xf32, #tpu.memory_space<vmem>>, vector<2x16x128xf32>
    tpu.vector_store %arg13[%c0_32, %c0_33, %c0_34], %34 {strides = array<i32>} : memref<2x16x128xf32, #tpu.memory_space<vmem>>, vector<2x16x128xf32>,
    %c0_35 = arith.constant 0 : index
    %c0_36 = arith.constant 0 : index
    %c0_37 = arith.constant 0 : index
    %36 = tpu.strided_load %arg13[%c0_35, %c0_36, %c0_37] {strides = array<i32: 1, 2, 1>} : memref<2x16x128xf32, #tpu.memory_space<vmem>>, vector<2x8x128xf32>
    %c0_38 = arith.constant 0 : index
    %c1_39 = arith.constant 1 : index
    %c0_40 = arith.constant 0 : index
    %37 = tpu.strided_load %arg13[%c0_38, %c1_39, %c0_40] {strides = array<i32: 1, 2, 1>} : memref<2x16x128xf32, #tpu.memory_space<vmem>>, vector<2x8x128xf32>
    %38 = arith.maximumf %36, %37 : vector<2x8x128xf32>
    %39 = vector.extract_strided_slice %38 {offsets = [0, 0, 0], sizes = [2, 8, 120], strides = [1, 1, 1]} : vector<2x8x128xf32> to vector<2x8x120xf32>
    %40 = vector.extract_strided_slice %38 {offsets = [0, 0, 8], sizes = [2, 8, 120], strides = [1, 1, 1]} : vector<2x8x128xf32> to vector<2x8x120xf32>
    %41 = arith.maximumf %39, %40 : vector<2x8x120xf32>
    %cst_41 = arith.constant 0.000000e+00 : bf16
    %42 = vector.broadcast %cst_41 : bf16 to vector<2x12x128xbf16>
    %c0_42 = arith.constant 0 : index
    %c0_43 = arith.constant 0 : index
    %c0_44 = arith.constant 0 : index
    %43 = vector.load %arg14[%c0_42, %c0_43, %c0_44] : memref<2x12x128xbf16, #tpu.memory_space<vmem>>, vector<2x12x128xbf16>
    tpu.vector_store %arg14[%c0_42, %c0_43, %c0_44], %42 {strides = array<i32>} : memref<2x12x128xbf16, #tpu.memory_space<vmem>>, vector<2x12x128xbf16>,
    %44 = arith.truncf %41 : vector<2x8x120xf32> to vector<2x8x120xbf16>
    %c0_45 = arith.constant 0 : index
    %c2_46 = arith.constant 2 : index
    %c0_47 = arith.constant 0 : index
    %45 = vector.load %arg14[%c0_45, %c2_46, %c0_47] : memref<2x12x128xbf16, #tpu.memory_space<vmem>>, vector<2x8x120xbf16>
    tpu.vector_store %arg14[%c0_45, %c2_46, %c0_47], %44 {strides = array<i32>} : memref<2x12x128xbf16, #tpu.memory_space<vmem>>, vector<2x8x120xbf16>,
    %c0_48 = arith.constant 0 : index
    %c0_49 = arith.constant 0 : index
    %c0_50 = arith.constant 0 : index
    %46 = vector.load %arg14[%c0_48, %c0_49, %c0_50] : memref<2x12x128xbf16, #tpu.memory_space<vmem>>, vector<2x8x128xbf16>
    %47 = vector.shape_cast %46 : vector<2x8x128xbf16> to vector<16x128xbf16>
    %c0_51 = arith.constant 0 : index
    %c0_52 = arith.constant 0 : index
    %c0_53 = arith.constant 0 : index
    %48 = vector.load %arg4[%c0_51, %c0_52, %c0_53] : memref<5x128x128xbf16, #tpu.memory_space<vmem>>, vector<1x128x128xbf16>
    %49 = vector.shape_cast %48 : vector<1x128x128xbf16> to vector<128x128xbf16>
    %cst_54 = arith.constant dense<0.000000e+00> : vector<16x128xf32>
    %50 = tpu.matmul %47, %49, %cst_54 {dimension_numbers = #tpu.dot_dimension_numbers<[1], [0], [0], [1], [0, 0, 1, 1], [], []>} : vector<16x128xbf16>, vector<128x128xbf16>, vector<16x128xf32> -> vector<16x128xf32>
    %c0_55 = arith.constant 0 : index
    %c1_56 = arith.constant 1 : index
    %c0_57 = arith.constant 0 : index
    %51 = vector.load %arg14[%c0_55, %c1_56, %c0_57] : memref<2x12x128xbf16, #tpu.memory_space<vmem>>, vector<2x8x128xbf16>
    %52 = vector.shape_cast %51 : vector<2x8x128xbf16> to vector<16x128xbf16>
    %c1_58 = arith.constant 1 : index
    %c0_59 = arith.constant 0 : index
    %c0_60 = arith.constant 0 : index
    %53 = vector.load %arg4[%c1_58, %c0_59, %c0_60] : memref<5x128x128xbf16, #tpu.memory_space<vmem>>, vector<1x128x128xbf16>
    %54 = vector.shape_cast %53 : vector<1x128x128xbf16> to vector<128x128xbf16>
    %cst_61 = arith.constant dense<0.000000e+00> : vector<16x128xf32>
    %55 = tpu.matmul %52, %54, %cst_61 {dimension_numbers = #tpu.dot_dimension_numbers<[1], [0], [0], [1], [0, 0, 1, 1], [], []>} : vector<16x128xbf16>, vector<128x128xbf16>, vector<16x128xf32> -> vector<16x128xf32>
    %56 = arith.addf %50, %55 : vector<16x128xf32>
    %c0_62 = arith.constant 0 : index
    %c2_63 = arith.constant 2 : index
    %c0_64 = arith.constant 0 : index
    %57 = vector.load %arg14[%c0_62, %c2_63, %c0_64] : memref<2x12x128xbf16, #tpu.memory_space<vmem>>, vector<2x8x128xbf16>
    %58 = vector.shape_cast %57 : vector<2x8x128xbf16> to vector<16x128xbf16>
    %c2_65 = arith.constant 2 : index
    %c0_66 = arith.constant 0 : index
    %c0_67 = arith.constant 0 : index
    %59 = vector.load %arg4[%c2_65, %c0_66, %c0_67] : memref<5x128x128xbf16, #tpu.memory_space<vmem>>, vector<1x128x128xbf16>
    %60 = vector.shape_cast %59 : vector<1x128x128xbf16> to vector<128x128xbf16>
    %cst_68 = arith.constant dense<0.000000e+00> : vector<16x128xf32>
    %61 = tpu.matmul %58, %60, %cst_68 {dimension_numbers = #tpu.dot_dimension_numbers<[1], [0], [0], [1], [0, 0, 1, 1], [], []>} : vector<16x128xbf16>, vector<128x128xbf16>, vector<16x128xf32> -> vector<16x128xf32>
    %62 = arith.addf %56, %61 : vector<16x128xf32>
    %c0_69 = arith.constant 0 : index
    %c3_70 = arith.constant 3 : index
    %c0_71 = arith.constant 0 : index
    %63 = vector.load %arg14[%c0_69, %c3_70, %c0_71] : memref<2x12x128xbf16, #tpu.memory_space<vmem>>, vector<2x8x128xbf16>
    %64 = vector.shape_cast %63 : vector<2x8x128xbf16> to vector<16x128xbf16>
    %c3_72 = arith.constant 3 : index
    %c0_73 = arith.constant 0 : index
    %c0_74 = arith.constant 0 : index
    %65 = vector.load %arg4[%c3_72, %c0_73, %c0_74] : memref<5x128x128xbf16, #tpu.memory_space<vmem>>, vector<1x128x128xbf16>
    %66 = vector.shape_cast %65 : vector<1x128x128xbf16> to vector<128x128xbf16>
    %cst_75 = arith.constant dense<0.000000e+00> : vector<16x128xf32>
    %67 = tpu.matmul %64, %66, %cst_75 {dimension_numbers = #tpu.dot_dimension_numbers<[1], [0], [0], [1], [0, 0, 1, 1], [], []>} : vector<16x128xbf16>, vector<128x128xbf16>, vector<16x128xf32> -> vector<16x128xf32>
    %68 = arith.addf %62, %67 : vector<16x128xf32>
    %c0_76 = arith.constant 0 : index
    %c4_77 = arith.constant 4 : index
    %c0_78 = arith.constant 0 : index
    %69 = vector.load %arg14[%c0_76, %c4_77, %c0_78] : memref<2x12x128xbf16, #tpu.memory_space<vmem>>, vector<2x8x128xbf16>
    %70 = vector.shape_cast %69 : vector<2x8x128xbf16> to vector<16x128xbf16>
    %c4_79 = arith.constant 4 : index
    %c0_80 = arith.constant 0 : index
    %c0_81 = arith.constant 0 : index
    %71 = vector.load %arg4[%c4_79, %c0_80, %c0_81] : memref<5x128x128xbf16, #tpu.memory_space<vmem>>, vector<1x128x128xbf16>
    %72 = vector.shape_cast %71 : vector<1x128x128xbf16> to vector<128x128xbf16>
    %cst_82 = arith.constant dense<0.000000e+00> : vector<16x128xf32>
    %73 = tpu.matmul %70, %72, %cst_82 {dimension_numbers = #tpu.dot_dimension_numbers<[1], [0], [0], [1], [0, 0, 1, 1], [], []>} : vector<16x128xbf16>, vector<128x128xbf16>, vector<16x128xf32> -> vector<16x128xf32>
    %74 = arith.addf %68, %73 : vector<16x128xf32>
    %c0_83 = arith.constant 0 : index
    %c0_84 = arith.constant 0 : index
    %75 = vector.load %arg5[%c0_83, %c0_84] : memref<1x128xf32, #tpu.memory_space<vmem>>, vector<1x128xf32>
    %76 = vector.broadcast %75 : vector<1x128xf32> to vector<16x128xf32>
    %77 = arith.addf %74, %76 : vector<16x128xf32>
    %cst_85 = arith.constant 0.000000e+00 : f32
    %78 = vector.broadcast %cst_85 : f32 to vector<16x128xf32>
    %79 = arith.maximumf %77, %78 : vector<16x128xf32>
    %80 = vector.shape_cast %79 : vector<16x128xf32> to vector<2x8x128xf32>
    %c0_86 = arith.constant 0 : index
    %c0_87 = arith.constant 0 : index
    %c0_88 = arith.constant 0 : index
    %81 = vector.load %arg15[%c0_86, %c0_87, %c0_88] : memref<2x8x128xf32, #tpu.memory_space<vmem>>, vector<2x8x128xf32>
    tpu.vector_store %arg15[%c0_86, %c0_87, %c0_88], %80 {strides = array<i32>} : memref<2x8x128xf32, #tpu.memory_space<vmem>>, vector<2x8x128xf32>,
    %c0_89 = arith.constant 0 : index
    %c0_90 = arith.constant 0 : index
    %c0_91 = arith.constant 0 : index
    %82 = tpu.strided_load %arg15[%c0_89, %c0_90, %c0_91] {strides = array<i32: 1, 2, 1>} : memref<2x8x128xf32, #tpu.memory_space<vmem>>, vector<2x4x128xf32>
    %c0_92 = arith.constant 0 : index
    %c1_93 = arith.constant 1 : index
    %c0_94 = arith.constant 0 : index
    %83 = tpu.strided_load %arg15[%c0_92, %c1_93, %c0_94] {strides = array<i32: 1, 2, 1>} : memref<2x8x128xf32, #tpu.memory_space<vmem>>, vector<2x4x128xf32>
    %84 = arith.maximumf %82, %83 : vector<2x4x128xf32>
    %85 = vector.extract_strided_slice %84 {offsets = [0, 0, 0], sizes = [2, 4, 112], strides = [1, 1, 1]} : vector<2x4x128xf32> to vector<2x4x112xf32>
    %86 = vector.extract_strided_slice %84 {offsets = [0, 0, 16], sizes = [2, 4, 112], strides = [1, 1, 1]} : vector<2x4x128xf32> to vector<2x4x112xf32>
    %87 = arith.maximumf %85, %86 : vector<2x4x112xf32>
    %cst_95 = arith.constant 0.000000e+00 : f32
    %88 = vector.broadcast %cst_95 : f32 to vector<2x4x16xf32>
    %89 = tpu.concatenate %87, %88 in 2 : vector<2x4x112xf32>, vector<2x4x16xf32> -> vector<2x4x128xf32>
    %90 = arith.truncf %89 : vector<2x4x128xf32> to vector<2x4x128xbf16>
    %91 = vector.extract_strided_slice %90 {offsets = [0, 0, 0], sizes = [2, 1, 128], strides = [1, 1, 1]} : vector<2x4x128xbf16> to vector<2x1x128xbf16>
    %92 = vector.shape_cast %91 : vector<2x1x128xbf16> to vector<2x128xbf16>
    %c0_96 = arith.constant 0 : index
    %c0_97 = arith.constant 0 : index
    %c0_98 = arith.constant 0 : index
    %93 = vector.load %arg6[%c0_96, %c0_97, %c0_98] : memref<4x128x128xbf16, #tpu.memory_space<vmem>>, vector<1x128x128xbf16>
    %94 = vector.shape_cast %93 : vector<1x128x128xbf16> to vector<128x128xbf16>
    %cst_99 = arith.constant dense<0.000000e+00> : vector<2x128xf32>
    %95 = tpu.matmul %92, %94, %cst_99 {dimension_numbers = #tpu.dot_dimension_numbers<[1], [0], [0], [1], [0, 0, 1, 1], [], []>} : vector<2x128xbf16>, vector<128x128xbf16>, vector<2x128xf32> -> vector<2x128xf32>
    %96 = vector.extract_strided_slice %90 {offsets = [0, 1, 0], sizes = [2, 1, 128], strides = [1, 1, 1]} : vector<2x4x128xbf16> to vector<2x1x128xbf16>
    %97 = vector.shape_cast %96 : vector<2x1x128xbf16> to vector<2x128xbf16>
    %c1_100 = arith.constant 1 : index
    %c0_101 = arith.constant 0 : index
    %c0_102 = arith.constant 0 : index
    %98 = vector.load %arg6[%c1_100, %c0_101, %c0_102] : memref<4x128x128xbf16, #tpu.memory_space<vmem>>, vector<1x128x128xbf16>
    %99 = vector.shape_cast %98 : vector<1x128x128xbf16> to vector<128x128xbf16>
    %cst_103 = arith.constant dense<0.000000e+00> : vector<2x128xf32>
    %100 = tpu.matmul %97, %99, %cst_103 {dimension_numbers = #tpu.dot_dimension_numbers<[1], [0], [0], [1], [0, 0, 1, 1], [], []>} : vector<2x128xbf16>, vector<128x128xbf16>, vector<2x128xf32> -> vector<2x128xf32>
    %101 = arith.addf %95, %100 : vector<2x128xf32>
    %102 = vector.extract_strided_slice %90 {offsets = [0, 2, 0], sizes = [2, 1, 128], strides = [1, 1, 1]} : vector<2x4x128xbf16> to vector<2x1x128xbf16>
    %103 = vector.shape_cast %102 : vector<2x1x128xbf16> to vector<2x128xbf16>
    %c2_104 = arith.constant 2 : index
    %c0_105 = arith.constant 0 : index
    %c0_106 = arith.constant 0 : index
    %104 = vector.load %arg6[%c2_104, %c0_105, %c0_106] : memref<4x128x128xbf16, #tpu.memory_space<vmem>>, vector<1x128x128xbf16>
    %105 = vector.shape_cast %104 : vector<1x128x128xbf16> to vector<128x128xbf16>
    %cst_107 = arith.constant dense<0.000000e+00> : vector<2x128xf32>
    %106 = tpu.matmul %103, %105, %cst_107 {dimension_numbers = #tpu.dot_dimension_numbers<[1], [0], [0], [1], [0, 0, 1, 1], [], []>} : vector<2x128xbf16>, vector<128x128xbf16>, vector<2x128xf32> -> vector<2x128xf32>
    %107 = arith.addf %101, %106 : vector<2x128xf32>
    %108 = vector.extract_strided_slice %90 {offsets = [0, 3, 0], sizes = [2, 1, 128], strides = [1, 1, 1]} : vector<2x4x128xbf16> to vector<2x1x128xbf16>
    %109 = vector.shape_cast %108 : vector<2x1x128xbf16> to vector<2x128xbf16>
    %c3_108 = arith.constant 3 : index
    %c0_109 = arith.constant 0 : index
    %c0_110 = arith.constant 0 : index
    %110 = vector.load %arg6[%c3_108, %c0_109, %c0_110] : memref<4x128x128xbf16, #tpu.memory_space<vmem>>, vector<1x128x128xbf16>
    %111 = vector.shape_cast %110 : vector<1x128x128xbf16> to vector<128x128xbf16>
    %cst_111 = arith.constant dense<0.000000e+00> : vector<2x128xf32>
    %112 = tpu.matmul %109, %111, %cst_111 {dimension_numbers = #tpu.dot_dimension_numbers<[1], [0], [0], [1], [0, 0, 1, 1], [], []>} : vector<2x128xbf16>, vector<128x128xbf16>, vector<2x128xf32> -> vector<2x128xf32>
    %113 = arith.addf %107, %112 : vector<2x128xf32>
    %c0_112 = arith.constant 0 : index
    %c0_113 = arith.constant 0 : index
    %114 = vector.load %arg7[%c0_112, %c0_113] : memref<1x128xf32, #tpu.memory_space<vmem>>, vector<1x128xf32>
    %115 = vector.broadcast %114 : vector<1x128xf32> to vector<2x128xf32>
    %116 = arith.addf %113, %115 : vector<2x128xf32>
    %cst_114 = arith.constant 0.000000e+00 : f32
    %117 = vector.broadcast %cst_114 : f32 to vector<2x128xf32>
    %118 = arith.maximumf %116, %117 : vector<2x128xf32>
    %119 = arith.truncf %118 : vector<2x128xf32> to vector<2x128xbf16>
    %c0_115 = arith.constant 0 : index
    %c0_116 = arith.constant 0 : index
    %120 = vector.load %arg8[%c0_115, %c0_116] : memref<128x128xbf16, #tpu.memory_space<vmem>>, vector<128x128xbf16>
    %cst_117 = arith.constant dense<0.000000e+00> : vector<2x128xf32>
    %121 = tpu.matmul %119, %120, %cst_117 {dimension_numbers = #tpu.dot_dimension_numbers<[1], [0], [0], [1], [0, 0, 1, 1], [], []>} : vector<2x128xbf16>, vector<128x128xbf16>, vector<2x128xf32> -> vector<2x128xf32>
    %c0_118 = arith.constant 0 : index
    %c0_119 = arith.constant 0 : index
    %122 = vector.load %arg9[%c0_118, %c0_119] : memref<1x128xf32, #tpu.memory_space<vmem>>, vector<1x128xf32>
    %123 = vector.broadcast %122 : vector<1x128xf32> to vector<2x128xf32>
    %124 = arith.addf %121, %123 : vector<2x128xf32>
    %cst_120 = arith.constant 0.000000e+00 : f32
    %125 = vector.broadcast %cst_120 : f32 to vector<2x128xf32>
    %126 = arith.maximumf %124, %125 : vector<2x128xf32>
    %127 = arith.truncf %126 : vector<2x128xf32> to vector<2x128xbf16>
    %c0_121 = arith.constant 0 : index
    %c0_122 = arith.constant 0 : index
    %128 = vector.load %arg10[%c0_121, %c0_122] : memref<128x128xbf16, #tpu.memory_space<vmem>>, vector<128x128xbf16>
    %cst_123 = arith.constant dense<0.000000e+00> : vector<2x128xf32>
    %129 = tpu.matmul %127, %128, %cst_123 {dimension_numbers = #tpu.dot_dimension_numbers<[1], [0], [0], [1], [0, 0, 1, 1], [], []>} : vector<2x128xbf16>, vector<128x128xbf16>, vector<2x128xf32> -> vector<2x128xf32>
    %c0_124 = arith.constant 0 : index
    %c0_125 = arith.constant 0 : index
    %130 = vector.load %arg11[%c0_124, %c0_125] : memref<1x128xf32, #tpu.memory_space<vmem>>, vector<1x128xf32>
    %131 = vector.broadcast %130 : vector<1x128xf32> to vector<2x128xf32>
    %132 = arith.addf %129, %131 : vector<2x128xf32>
    %c0_126 = arith.constant 0 : index
    %c0_127 = arith.constant 0 : index
    %133 = vector.load %arg12[%c0_126, %c0_127] : memref<2x128xf32, #tpu.memory_space<vmem>>, vector<2x128xf32>
    tpu.vector_store %arg12[%c0_126, %c0_127], %132 {strides = array<i32>} : memref<2x128xf32, #tpu.memory_space<vmem>>, vector<2x128xf32>,
    return
  }
  func.func @transform_0(%arg0: i32) -> (i32, i32, i32) {
    %c0_i32 = arith.constant 0 : i32
    %c0_i32_0 = arith.constant 0 : i32
    %c0_i32_1 = arith.constant 0 : i32
    return %arg0, %c0_i32, %c0_i32_0 : i32, i32, i32
  }
  func.func @transform_1(%arg0: i32) -> (i32, i32, i32) {
    %c0_i32 = arith.constant 0 : i32
    %c0_i32_0 = arith.constant 0 : i32
    %c0_i32_1 = arith.constant 0 : i32
    %c0_i32_2 = arith.constant 0 : i32
    return %c0_i32, %c0_i32_0, %c0_i32_1 : i32, i32, i32
  }
  func.func @transform_2(%arg0: i32) -> (i32, i32) {
    %c0_i32 = arith.constant 0 : i32
    %c0_i32_0 = arith.constant 0 : i32
    %c0_i32_1 = arith.constant 0 : i32
    return %c0_i32, %c0_i32_0 : i32, i32
  }
  func.func @transform_3(%arg0: i32) -> (i32, i32, i32) {
    %c0_i32 = arith.constant 0 : i32
    %c0_i32_0 = arith.constant 0 : i32
    %c0_i32_1 = arith.constant 0 : i32
    %c0_i32_2 = arith.constant 0 : i32
    return %c0_i32, %c0_i32_0, %c0_i32_1 : i32, i32, i32
  }
  func.func @transform_4(%arg0: i32) -> (i32, i32) {
    %c0_i32 = arith.constant 0 : i32
    %c0_i32_0 = arith.constant 0 : i32
    %c0_i32_1 = arith.constant 0 : i32
    return %c0_i32, %c0_i32_0 : i32, i32
  }
  func.func @transform_5(%arg0: i32) -> (i32, i32, i32) {
    %c0_i32 = arith.constant 0 : i32
    %c0_i32_0 = arith.constant 0 : i32
    %c0_i32_1 = arith.constant 0 : i32
    %c0_i32_2 = arith.constant 0 : i32
    return %c0_i32, %c0_i32_0, %c0_i32_1 : i32, i32, i32
  }
  func.func @transform_6(%arg0: i32) -> (i32, i32) {
    %c0_i32 = arith.constant 0 : i32
    %c0_i32_0 = arith.constant 0 : i32
    %c0_i32_1 = arith.constant 0 : i32
    return %c0_i32, %c0_i32_0 : i32, i32
  }
  func.func @transform_7(%arg0: i32) -> (i32, i32) {
    %c0_i32 = arith.constant 0 : i32
    %c0_i32_0 = arith.constant 0 : i32
    %c0_i32_1 = arith.constant 0 : i32
    return %c0_i32, %c0_i32_0 : i32, i32
  }
  func.func @transform_8(%arg0: i32) -> (i32, i32) {
    %c0_i32 = arith.constant 0 : i32
    %c0_i32_0 = arith.constant 0 : i32
    %c0_i32_1 = arith.constant 0 : i32
    return %c0_i32, %c0_i32_0 : i32, i32
  }
  func.func @transform_9(%arg0: i32) -> (i32, i32) {
    %c0_i32 = arith.constant 0 : i32
    %c0_i32_0 = arith.constant 0 : i32
    %c0_i32_1 = arith.constant 0 : i32
    return %c0_i32, %c0_i32_0 : i32, i32
  }
  func.func @transform_10(%arg0: i32) -> (i32, i32) {
    %c0_i32 = arith.constant 0 : i32
    %c0_i32_0 = arith.constant 0 : i32
    %c0_i32_1 = arith.constant 0 : i32
    return %c0_i32, %c0_i32_0 : i32, i32
  }
  func.func @transform_11(%arg0: i32) -> (i32, i32) {
    %c0_i32 = arith.constant 0 : i32
    %c0_i32_0 = arith.constant 0 : i32
    return %arg0, %c0_i32 : i32, i32
  }
}

</mosaic_0001>

<bundles_post_ra>
// kernel: lenet5_forward.1
= control target key start
LH: loop header
LB: loop body
LE: loop exit
PB: predicated region body
PF: predicated region fallthrough
CT: control target
= control target key end

     0   :  { %16 = vsyncpa [#allocation6], 0  ;;  %s3434_s0 = inlined_call_operand.vmem [shape: bf16[2,20,128], index: 0, kind: input, shape index: {}]   ;;  %s3435_s1 = inlined_call_operand.vmem [shape: bf16[5,128,128], index: 1, kind: input, shape index: {}]   ;;  %s3436_s2 = inlined_call_operand.hbm [shape: f32[1,128], index: 2, kind: input, shape index: {}]   ;;  %s3437_s3 = inlined_call_operand.vmem [shape: bf16[5,128,128], index: 3, kind: input, shape index: {}]   ;;  %s3438_s4 = inlined_call_operand.hbm [shape: f32[1,128], index: 4, kind: input, shape index: {}]   ;;  %s3439_s5 = inlined_call_operand.hbm [shape: bf16[4,128,128], index: 5, kind: input, shape index: {}]   ;;  %s3440_s6 = inlined_call_operand.hbm [shape: f32[1,128], index: 6, kind: input, shape index: {}]   ;;  %s3441_s7 = inlined_call_operand.vmem [shape: bf16[128,128], index: 7, kind: input, shape index: {}]   ;;  %s3442_s8 = inlined_call_operand.hbm [shape: f32[1,128], index: 8, kind: input, shape index: {}]   ;;  %s3443_s9 = inlined_call_operand.hbm [shape: bf16[128,128], index: 9, kind: input, shape index: {}]   ;;  %s3444_s10 = inlined_call_operand.hbm [shape: f32[1,128], index: 10, kind: input, shape index: {}]   ;;  %s3445_s11 = inlined_call_operand.hbm [shape: f32[2,128], index: 11, kind: output, shape index: {}]  }
   0x1   :  { %17 = vsyncpa [#allocation9], 0 }
   0x2   :  { %18 = vsyncpa [#allocation12], 0 }
   0x3   :  { %19 = vsyncpa [#allocation15], 0  ;;  %s43_s19 = sshll.u32 %s3438_s4, 4  ;;  %s44_s19 = int_to_ptr.hbm [resolvable:$true] %s43_s19 }
   0x4   :  { %20 = vsyncpa [#allocation7], 0  ;;  %s2934_s20 = smov [#allocation8]   ;;  %s67_s24 = sshll.u32 %s3440_s6, 4  ;;  %s68_s24 = int_to_ptr.hbm [resolvable:$true] %s67_s24 }
   0x5   :  { %s45_s21 = sshll.u32 %s2934_s20, 4  ;;  %s2935_s25 = smov [#allocation11]   ;;  %s46_s21 = int_to_ptr.vmem [resolvable:$true] %s45_s21 }
   0x6   :  { %48 = dma.hbm_to_vmem [thread:$0]  %s44_s19, 16, %s46_s21, [#allocation9]  }
   0x7   :  { %s69_s26 = sshll.u32 %s2935_s25, 4  ;;  %s90_s29 = sshll.u32 %s3443_s9, 4  ;;  %s70_s26 = int_to_ptr.vmem [resolvable:$true] %s69_s26  ;;  %s91_s29 = int_to_ptr.hbm [resolvable:$true] %s90_s29 }
   0x8   :  { %72 = dma.hbm_to_vmem [thread:$0]  %s68_s24, 16, %s70_s26, [#allocation12]  }
   0x9   :  { %s2936_s4 = smov [#allocation14]   ;;  %s30_s14 = sshll.u32 %s3436_s2, 4  ;;  %s31_s14 = int_to_ptr.hbm [resolvable:$true] %s30_s14 }
   0xa   :  { %s92_s30 = sshll.u32 %s2936_s4, 4  ;;  %s2937_s15 = smov 64   ;;  %s93_s30 = int_to_ptr.vmem [resolvable:$true] %s92_s30 }
   0xb   :  { %s2938_s6 = smov 4   ;;  %s2939_s16 = smov [#allocation5]  }
   0xc   :  { %98 = dma.hbm_to_vmem [thread:$0]  %s91_s29, 1024, %s93_s30, [#allocation15], %s2937_s15, %s2937_s15, %s2938_s6  }
   0xd   :  { %s32_s17 = sshll.u32 %s2939_s16, 4  ;;  %s53_s20 = sshll.u32 %s3439_s5, 4  ;;  %s33_s17 = int_to_ptr.vmem [resolvable:$true] %s32_s17  ;;  %s54_s20 = int_to_ptr.hbm [resolvable:$true] %s53_s20 }
   0xe   :  { %35 = dma.hbm_to_vmem [thread:$0]  %s31_s14, 16, %s33_s17, [#allocation6]  }
   0xf   :  { %s80_s22 = sshll.u32 %s3442_s8, 4  ;;  %s2940_s23 = smov [#allocation10]   ;;  %s81_s22 = int_to_ptr.hbm [resolvable:$true] %s80_s22 }
  0x10   :  { %s55_s24 = sshll.u32 %s2940_s23, 4  ;;  %s2941_s2 = smov [#allocation13]   ;;  %s56_s24 = int_to_ptr.vmem [resolvable:$true] %s55_s24 }
  0x11   :  { %61 = dma.hbm_to_vmem [thread:$0]  %s54_s20, 4096, %s56_s24, [#allocation9], %s2937_s15, %s2937_s15, %s2938_s6  }
  0x12   :  { %s82_s25 = sshll.u32 %s2941_s2, 4  ;;  %s104_s28 = sshll.u32 %s3444_s10, 4  ;;  %s83_s25 = int_to_ptr.vmem [resolvable:$true] %s82_s25  ;;  %s105_s28 = int_to_ptr.hbm [resolvable:$true] %s104_s28 }
  0x13   :  { %85 = dma.hbm_to_vmem [thread:$0]  %s81_s22, 16, %s83_s25, [#allocation12]  }
  0x14   :  { %s2942_s5 = smov [#allocation16]  }
  0x15   :  { %s106_s29 = sshll.u32 %s2942_s5, 4  ;;  %s107_s29 = int_to_ptr.vmem [resolvable:$true] %s106_s29 }
  0x16   :  { %109 = dma.hbm_to_vmem [thread:$0]  %s105_s28, 16, %s107_s29, [#allocation15]  }
  0x17   :  { %2924 = dma.done.wait [#allocation6], 16  }
  0x18   :  { %2925 = vsyncadd [#allocation6], 4294967280 }
  0x19   :  { %2926 = dma.done.wait [#allocation9], 4112  }
  0x1a   :  { %2927 = vsyncadd [#allocation9], 4294963184 }
  0x1b   :  { %2928 = dma.done.wait [#allocation12], 32  }
  0x1c   :  { %2929 = vsyncadd [#allocation12], 4294967264 }
  0x1d   :  { %2930 = dma.done.wait [#allocation15], 1040  }
  0x1e   :  { %2931 = vsyncadd [#allocation15], 4294966256  ;;  %v2590_v0 = vld [vmem:[%s3435_s1 + $0x78] sm:$0xff]  ;;  %v2589_v4 = vld [vmem:[%s3435_s1 + $0x70] sm:$0xff]  ;;  %vm161_vm0 = vsmask.f32 3328 }
  0x1f   :  { %v2582_v1 = vld [vmem:[%s3435_s1 + $0x38] sm:$0xff]  ;;  %285 = vmatpush.bf16.msra.mxu0 %v2590_v0  ;;  %v2581_v5 = vld [vmem:[%s3435_s1 + $0x30] sm:$0xff]  ;;  %v2588_v8 = vld [vmem:[%s3435_s1 + $0x68] sm:$0xff]  ;;  %vm162_vm1 = vsmask.f32 7440  ;;  %vm389_vm2 = vcmask 1042432  }
  0x20   :  { %v2598_v2 = vld [vmem:[%s3435_s1 + $0xb8] sm:$0xff]  ;;  %364 = vmatpush.bf16.msra.mxu1 %v2582_v1  ;;  %v2597_v6 = vld [vmem:[%s3435_s1 + $0xb0] sm:$0xff]  ;;  %v2580_v9 = vld [vmem:[%s3435_s1 + $0x28] sm:$0xff]  ;;  %vm390_vm3 = vcmask 1046532   ;;  %vm504_vm4 = vsmask.f32 2304 }
  0x21   :  { %v2606_v3 = vld [vmem:[%s3435_s1 + $0xf8] sm:$0xff]  ;;  %479 = vmatpush.bf16.msra.mxu2 %v2598_v2  ;;  %v2605_v7 = vld [vmem:[%s3435_s1 + $0xf0] sm:$0xff]  ;;  %v2596_v10 = vld [vmem:[%s3435_s1 + $0xa8] sm:$0xff]  ;;  %vm505_vm5 = vsmask.f32 6416  ;;  %vm655_vm9 = vcmask 1041408  }
  0x22   :  { %626 = vmatpush.bf16.msra.mxu3 %v2606_v3  ;;  %v2604_v11 = vld [vmem:[%s3435_s1 + $0xe8] sm:$0xff]  ;;  %v2587_v12 = vld [vmem:[%s3435_s1 + $0x60] sm:$0xff]  ;;  %v2586_v28 = vld [vmem:[%s3435_s1 + $0x58] sm:$0xff]  ;;  %vm656_vm10 = vcmask 1045508   ;;  %s2944_s5 = smov 120   ;;  %vm819_vm12 = vcmask 977921  }
  0x23   :  { %286 = vmatpush.bf16.msra.mxu0 %v2589_v4  ;;  %v2579_v13 = vld [vmem:[%s3435_s1 + $0x20] sm:$0xff]  ;;  %v159_v18 = vld [vmem:[%s3434_s0 + $0x8] sm:$0x1]  ;;  %v2578_v29 = vld [vmem:[%s3435_s1 + $0x18] sm:$0xff]  ;;  %vm821_vm13 = vcmask 974848   ;;  %vm1374_vm14 = vcmask 916480  }
  0x24   :  { %365 = vmatpush.bf16.msra.mxu1 %v2581_v5  ;;  %v2595_v14 = vld [vmem:[%s3435_s1 + $0xa0] sm:$0xff]  ;;  %v184_v26 = vshll.u32 %v159_v18, 16  ;;  %v2594_v30 = vld [vmem:[%s3435_s1 + $0x98] sm:$0xff]  ;;  %v397_v36 = vrot.slane %v159_v18, 5  ;;  %v3108_v37 = vld [vmem:[%s3434_s0 + $0x8] sm:$0x3] }
  0x25   :  { %480 = vmatpush.bf16.msra.mxu2 %v2597_v6  ;;  %v2603_v15 = vld [vmem:[%s3435_s1 + $0xe0] sm:$0xff]  ;;  %v2602_v33 = vld [vmem:[%s3435_s1 + $0xd8] sm:$0xff]  ;;  %vm3112_vm6 = vmor %vm389_vm2, %vm390_vm3  ;;  %v522_v55 = vshrl.u32 %v3108_v37, 16  ;;  %v525_v59 = vshll.u32 %v3108_v37, 16  ;;  %vm1421_vm15 = vcmask 1041409   ;;  %s1898_s24 = sshll.u32 %s3445_s11, 4  ;;  %s1899_s24 = int_to_ptr.hbm [resolvable:$true] %s1898_s24 }
  0x26   :  { %627 = vmatpush.bf16.msra.mxu3 %v2605_v7  ;;  %v139_v16 = vld [vmem:[%s3434_s0] sm:$0xf]  ;;  %v3082_v17 = vld [vmem:[%s3434_s0 + $0x4] sm:$0xf]  ;;  %vm3118_vm7 = vmor %vm161_vm0, %vm162_vm1  ;;  %v186_v46 = vrot.slane %v184_v26, 5 }
  0x27   :  { %287 = vmatpush.bf16.msra.mxu0 %v2588_v8  ;;  %v165_v19 = vshrl.u32 %v139_v16, 16  ;;  %v168_v20 = vshll.u32 %v139_v16, 16  ;;  %v174_v21 = vshll.u32 %v3082_v17, 16  ;;  %v178_v22 = vshrl.u32 %v3082_v17, 16  ;;  %v383_v23 = vld [vmem:[%s3434_s0] sm:$0xe]  ;;  %vm3157_vm8 = vmor %vm504_vm4, %vm505_vm5 }
  0x28   :  { %366 = vmatpush.bf16.msra.mxu1 %v2580_v9  ;;  %v394_v27 = vrot.slane %v3082_v17, 5  ;;  %v1999_v35 = vrot.slane %v383_v23, 9  ;;  %v508_v38 = vshrl.u32 %v383_v23, 16  ;;  %v511_v42 = vshll.u32 %v383_v23, 16  ;;  %v141_v49 = vld [vmem:[%s3434_s0 + $0xc] sm:$0xf]  ;;  %vm3248_vm11 = vmor %vm655_vm9, %vm656_vm10 }
  0x29   :  { %481 = vmatpush.bf16.msra.mxu2 %v2596_v10  ;;  %v167_v24 = vrot.slane %v165_v19, 4  ;;  %v170_v25 = vrot.slane %v168_v20, 5  ;;  %v176_v31 = vrot.slane %v174_v21, 5  ;;  %v180_v32 = vrot.slane %v178_v22, 4  ;;  %v2585_v50 = vld [vmem:[%s3435_s1 + $0x50] sm:$0xff]  ;;  %v2584_v1 = vld [vmem:[%s3435_s1 + $0x48] sm:$0xff] }
  0x2a   :  { %628 = vmatpush.bf16.msra.mxu3 %v2604_v11  ;;  %v396_v41 = vrot.slane %v394_v27, 4  ;;  %v516_v43 = vrot.slane %v178_v22, 5  ;;  %v510_v47 = vrot.slane %v508_v38, 5  ;;  %v517_v48 = vrot.slane %v174_v21, 6  ;;  %v2577_v51 = vld [vmem:[%s3435_s1 + $0x10] sm:$0xff]  ;;  %v2576_v7 = vld [vmem:[%s3435_s1 + $0x8] sm:$0xff] }
  0x2b   :  { %288 = vmatpush.bf16.msra.mxu0 %v2587_v12  ;;  %v171_v34 = vor.u32 %v170_v25, %v167_v24  ;;  %v181_v39 = vor.u32 %v180_v32, %v176_v31  ;;  %v2593_v52 = vld [vmem:[%s3435_s1 + $0x90] sm:$0xff]  ;;  %v513_v54 = vrot.slane %v511_v42, 6  ;;  %v395_v57 = vsel %vm3112_vm6, %v1999_v35, %v394_v27  ;;  %v2592_v11 = vld [vmem:[%s3435_s1 + $0x88] sm:$0xff]  ;;  %v2583_v25 = vld [vmem:[%s3435_s1 + $0x40] sm:$0xff] }
  0x2c   :  { %367 = vmatpush.bf16.msra.mxu1 %v2579_v13  ;;  %v2601_v56 = vld [vmem:[%s3435_s1 + $0xd0] sm:$0xff]  ;;  %v518_v58 = vor.u32 %v517_v48, %v516_v43  ;;  %v398_v62 = vsel %vm3112_vm6, %v396_v41, %v397_v36  ;;  %v189_v0 = vshrl.u32 %v141_v49, 16  ;;  %v524_v5 = vrot.slane %v522_v55, 5  ;;  %v2600_v12 = vld [vmem:[%s3435_s1 + $0xc8] sm:$0xff]  ;;  %v2575_v26 = vld [vmem:[%s3435_s1] sm:$0xff] }
  0x2d   :  { %482 = vmatpush.bf16.msra.mxu2 %v2595_v14  ;;  %v172_v45 = vrot.slane %v171_v34, 4  ;;  %v182_v53 = vrot.slane %v181_v39, 4  ;;  %v3144_v60 = vld [vmem:[%s3434_s0 + $0x10] sm:$0xf]  ;;  %v514_v63 = vor.u32 %v513_v54, %v510_v47  ;;  %v527_v6 = vrot.slane %v525_v59, 6  ;;  %v2591_v32 = vld [vmem:[%s3435_s1 + $0x80] sm:$0xff] }
  0x2e   :  { %629 = vmatpush.bf16.msra.mxu3 %v2603_v15  ;;  %v520_v4 = vrot.slane %v518_v58, 4  ;;  %v192_v9 = vshll.u32 %v141_v49, 16  ;;  %v198_v10 = vshll.u32 %v3144_v60, 16  ;;  %v423_v13 = vunpack.c.l.b16 %v395_v57  ;;  %v3177_v21 = vld [vmem:[%s3434_s0 + $0xc] sm:$0xe]  ;;  %v2614_v41 = vld [vmem:[%s3435_s1 + $0x138] sm:$0xff] }
  0x2f   :  { %289 = vmatpush.bf16.msra.mxu0 %v2586_v28  ;;  %v177_v61 = vsel %vm3118_vm7, %v172_v45, %v176_v31  ;;  %v187_v2 = vsel %vm3118_vm7, %v182_v53, %v186_v46  ;;  %v515_v8 = vrot.slane %v514_v63, 4  ;;  %v528_v14 = vor.u32 %v527_v6, %v524_v5  ;;  %v3199_v34 = vld [vmem:[%s3434_s0 + $0x14] sm:$0x3]  ;;  %v2573_v43 = vld [vmem:[%s3434_s0] sm:$0xff]  ;;  %v2612_v6 = vld [vmem:[%s3435_s1 + $0x128] sm:$0xff] }
  0x30   :  { %368 = vmatpush.bf16.msra.mxu1 %v2578_v29  ;;  %v202_v15 = vshrl.u32 %v3144_v60, 16  ;;  %v229_v16 = vunpack.c.l.b16 %v177_v61  ;;  %v230_v18 = vunpack.c.l.b16 %v187_v2  ;;  %v424_v19 = vunpack.c.l.b16 %v398_v62  ;;  %v160_v29 = vld [vmem:[%s3434_s0 + $0x14] sm:$0x1] }
  0x31   :  { %483 = vmatpush.bf16.msra.mxu2 %v2594_v30  ;;  %v519_v20 = vsel %vm3157_vm8, %v515_v8, %v518_v58  ;;  %v529_v22 = vsel %vm3157_vm8, %v520_v4, %v528_v14  ;;  %v191_v23 = vrot.slane %v189_v0, 4  ;;  %v194_v24 = vrot.slane %v192_v9, 5  ;;  %v2613_v55 = vld [vmem:[%s3435_s1 + $0x130] sm:$0xff]  ;;  %v2611_v14 = vld [vmem:[%s3435_s1 + $0x120] sm:$0xff] }
  0x32   :  { %630 = vmatpush.bf16.msra.mxu3 %v2602_v33  ;;  %v570_v27 = vunpack.c.l.b16 %v519_v20  ;;  %v571_v28 = vunpack.c.l.b16 %v529_v22  ;;  %v200_v30 = vrot.slane %v198_v10, 5  ;;  %v204_v31 = vrot.slane %v202_v15, 4  ;;  %v2599_v33 = vld [vmem:[%s3435_s1 + $0xc0] sm:$0xff]  ;;  %v2610_v22 = vld [vmem:[%s3435_s1 + $0x118] sm:$0xff] }
  0x33   :  { %290 = vmatpush.bf16.msra.mxu0 %v2585_v50  ;;  %v531_v35 = vshrl.u32 %v3177_v21, 16  ;;  %v534_v36 = vshll.u32 %v3177_v21, 16  ;;  %v233_v38 = vpack.c.b16 %v230_v18, %v229_v16  ;;  %v427_v39 = vpack.c.b16 %v424_v19, %v423_v13 }
  0x34   :  { %369 = vmatpush.bf16.msra.mxu1 %v2577_v51  ;;  %v539_v42 = vrot.slane %v202_v15, 5  ;;  %v195_v45 = vor.u32 %v194_v24, %v191_v23  ;;  %v208_v46 = vshll.u32 %v160_v29, 16  ;;  %v574_v49 = vpack.c.b16 %v571_v28, %v570_v27  ;;  %v2574_v24 = vld [vmem:[%s3434_s0 + $0xc] sm:$0xff]  ;;  %v649_v28 = vld [vmem:[%s3434_s0] sm:$0xc] }
  0x35   :  { %484 = vmatpush.bf16.msra.mxu2 %v2593_v52  ;;  %v533_v47 = vrot.slane %v531_v35, 5  ;;  %v536_v48 = vrot.slane %v534_v36, 6  ;;  %v205_v50 = vor.u32 %v204_v31, %v200_v30  ;;  %v540_v51 = vrot.slane %v198_v10, 6 }
  0x36   :  { %631 = vmatpush.bf16.msra.mxu3 %v2601_v56  ;;  %v545_v52 = vshrl.u32 %v3199_v34, 16  ;;  %v401_v53 = vrot.slane %v3144_v60, 5  ;;  %v548_v58 = vshll.u32 %v3199_v34, 16  ;;  %v2000_v59 = vrot.slane %v3177_v21, 9 }
  0x37   :  { %291 = vmatpush.bf16.msra.mxu0 %v2584_v1  ;;  %v537_v54 = vor.u32 %v536_v48, %v533_v47  ;;  %v541_v56 = vor.u32 %v540_v51, %v539_v42  ;;  %v196_v61 = vrot.slane %v195_v45, 4  ;;  %v206_v62 = vrot.slane %v205_v50, 4 }
  0x38   :  { %370 = vmatpush.bf16.msra.mxu1 %v2576_v7  ;;  %v547_v57 = vrot.slane %v545_v52, 5  ;;  %v210_v63 = vrot.slane %v208_v46, 5  ;;  %v550_v0 = vrot.slane %v548_v58, 6  ;;  %v403_v1 = vrot.slane %v401_v53, 4 }
  0x39   :  { %485 = vmatpush.bf16.msra.mxu2 %v2592_v11  ;;  %v404_v2 = vrot.slane %v160_v29, 5  ;;  %v538_v4 = vrot.slane %v537_v54, 4  ;;  %v543_v5 = vrot.slane %v541_v56, 4  ;;  %v201_v8 = vsel %vm3118_vm7, %v196_v61, %v200_v30  ;;  %v2609_v29 = vld [vmem:[%s3435_s1 + $0x110] sm:$0xff] }
  0x3a   :  { %632 = vmatpush.bf16.msra.mxu3 %v2600_v12  ;;  %v551_v7 = vor.u32 %v550_v0, %v547_v57  ;;  %v211_v9 = vsel %vm3118_vm7, %v206_v62, %v210_v63  ;;  %v402_v10 = vsel %vm3112_vm6, %v2000_v59, %v401_v53  ;;  %v231_v15 = vunpack.c.l.b16 %v201_v8  ;;  %v2727_v0 = vld [vmem:[#allocation5] ss:$0 sm:$0xff] }
  0x3b   :  { %292 = vmatpush.bf16.msra.mxu0 %v2583_v25  ;;  %v405_v11 = vsel %vm3112_vm6, %v403_v1, %v404_v2  ;;  %v542_v12 = vsel %vm3157_vm8, %v538_v4, %v541_v56  ;;  %v232_v16 = vunpack.c.l.b16 %v211_v9  ;;  %v425_v18 = vunpack.c.l.b16 %v402_v10 }
  0x3c   :  { %371 = vmatpush.bf16.msra.mxu1 %v2575_v26  ;;  %v552_v13 = vsel %vm3157_vm8, %v543_v5, %v551_v7  ;;  %v426_v19 = vunpack.c.l.b16 %v405_v11  ;;  %v572_v20 = vunpack.c.l.b16 %v542_v12  ;;  %v660_v27 = vrot.slane %v3082_v17, 6  ;;  %v2662_v17 = vld [vmem:[#allocation10 + $0x30] sm:$0xff] }
  0x3d   :  { %486 = vmatpush.bf16.msra.mxu2 %v2591_v32  ;;  %v573_v21 = vunpack.c.l.b16 %v552_v13  ;;  %v234_v23 = vpack.c.b16 %v232_v16, %v231_v15  ;;  %v2097_v30 = vrot.slane %v649_v28, 10  ;;  %v663_v32 = vrot.slane %v3108_v37, 6  ;;  %v2607_v37 = vld [vmem:[%s3435_s1 + $0x100] sm:$0xff]  ;;  %v2647_v28 = vld [vmem:[%s3437_s3 + $0xf8] sm:$0xff] }
  0x3e   :  { %633 = vmatpush.bf16.msra.mxu3 %v2599_v33  ;;  %293 = vmatmul.bf16.vlgmr.msra.gmra.mxu0 %v233_v38  ;;  %v428_v25 = vpack.c.b16 %v426_v19, %v425_v18  ;;  %v662_v31 = vrot.slane %v660_v27, 4  ;;  %v2608_v33 = vld [vmem:[%s3435_s1 + $0x108] sm:$0xff]  ;;  %v667_v42 = vrot.slane %v3144_v60, 6  ;;  %v670_v47 = vrot.slane %v3199_v34, 6  ;;  %v2631_v19 = vld [vmem:[%s3437_s3 + $0x78] sm:$0xff] }
  0x3f   :  { %745 = vmatpush.bf16.msrb.mxu0 %v2614_v41  ;;  %372 = vmatmul.bf16.vlgmr.msra.gmra.mxu1 %v2573_v43  ;;  %v575_v26 = vpack.c.b16 %v573_v21, %v572_v20  ;;  %v661_v35 = vsel %vm3248_vm11, %v2097_v30, %v660_v27  ;;  %v650_v43 = vld [vmem:[%s3434_s0 + $0xc] sm:$0xc]  ;;  %v2623_v20 = vld [vmem:[%s3437_s3 + $0x38] sm:$0xff]  ;;  %v2638_v27 = vld [vmem:[%s3437_s3 + $0xb0] sm:$0xff] }
  0x40   :  { %487 = vmatmul.bf16.vlgmr.msra.gmra.mxu2 %v427_v39  ;;  %v664_v36 = vsel %vm3248_vm11, %v662_v31, %v663_v32  ;;  %v689_v38 = vunpack.c.l.b16 %v661_v35  ;;  %v2098_v45 = vrot.slane %v650_v43, 10  ;;  %v669_v46 = vrot.slane %v667_v42, 4  ;;  %v2639_v21 = vld [vmem:[%s3437_s3 + $0xb8] sm:$0xff]  ;;  %942 = vmatpush.bf16.msrb.mxu1 %v2631_v19  ;;  %v2629_v35 = vld [vmem:[%s3437_s3 + $0x68] sm:$0xff]  ;;  %v2620_v43 = vld [vmem:[%s3437_s3 + $0x20] sm:$0xff] }
  0x41   :  { %634 = vmatmul.bf16.vlgmr.msra.gmra.mxu3 %v574_v49  ;;  %v690_v39 = vunpack.c.l.b16 %v664_v36  ;;  %1010 = vmatpush.bf16.msrb.mxu2 %v2623_v20  ;;  %v2621_v36 = vld [vmem:[%s3437_s3 + $0x28] sm:$0xff] }
  0x42   :  { %v668_v48 = vsel %vm3248_vm11, %v2098_v45, %v667_v42  ;;  %v671_v49 = vsel %vm3248_vm11, %v669_v46, %v670_v47  ;;  %1107 = vmatpush.bf16.msrb.mxu3 %v2639_v21  ;;  %v2628_v42 = vld [vmem:[%s3437_s3 + $0x60] sm:$0xff] }
  0x43   :  { %746 = vmatpush.bf16.msrb.mxu0 %v2613_v55  ;;  %v693_v41 = vpack.c.b16 %v690_v39, %v689_v38  ;;  %v691_v50 = vunpack.c.l.b16 %v668_v48  ;;  %v692_v51 = vunpack.c.l.b16 %v671_v49 }
  0x45   :  { %v694_v52 = vpack.c.b16 %v692_v51, %v691_v50 }
  0x46   :  { %1108 = vmatpush.bf16.msrb.mxu3 %v2638_v27 }
  0x47   :  { %747 = vmatpush.bf16.msrb.mxu0 %v2612_v6 }
  0x4b   :  { %748 = vmatpush.bf16.msrb.mxu0 %v2611_v14 }
  0x4e   :  { %298 = vmatmul.bf16.gmra.mxu0 %v234_v23 }
  0x4f   :  { %749 = vmatpush.bf16.msrb.mxu0 %v2610_v22  ;;  %377 = vmatmul.bf16.gmra.mxu1 %v2574_v24  ;;  %v2943_v22 = vmov 0   ;;  %v2630_v24 = vld [vmem:[%s3437_s3 + $0x70] sm:$0xff] }
  0x50   :  { %492 = vmatmul.bf16.gmra.mxu2 %v428_v25  ;;  %803 = vst [vmem:[#allocation3] sm:$0xf] %v2943_v22  ;;  %v2622_v25 = vld [vmem:[%s3437_s3 + $0x30] sm:$0xff]  ;;  %943 = vmatpush.bf16.msrb.mxu1 %v2630_v24 }
  0x51   :  { %639 = vmatmul.bf16.gmra.mxu3 %v575_v26  ;;  %804 = vst [vmem:[#allocation3 + $0x4] sm:$0x3] %v2943_v22  ;;  %1011 = vmatpush.bf16.msrb.mxu2 %v2622_v25 }
  0x52   :  { %805 = vst [vmem:[#allocation3 + $0x8] sm:$0xf] %v2943_v22 }
  0x53   :  { %750 = vmatpush.bf16.msrb.mxu0 %v2609_v29  ;;  %806 = vst [vmem:[#allocation3 + $0xc] sm:$0x3] %v2943_v22 }
  0x54   :  { %944 = vmatpush.bf16.msrb.mxu1 %v2629_v35 }
  0x55   :  { %1012 = vmatpush.bf16.msrb.mxu2 %v2621_v36 }
  0x57   :  { %751 = vmatpush.bf16.msrb.mxu0 %v2608_v33 }
  0x58   :  { %945 = vmatpush.bf16.msrb.mxu1 %v2628_v42 }
  0x59   :  { %1013 = vmatpush.bf16.msrb.mxu2 %v2620_v43 }
  0x5b   :  { %752 = vmatpush.bf16.msrb.mxu0 %v2607_v37 }
  0x5e   :  { %753 = vmatmul.bf16.vlgmr.msrb.gmra.mxu0 %v693_v41 }
  0x5f   :  { %1230 = vmatpush.bf16.msra.mxu0 %v2647_v28 }
  0x6e   :  { %758 = vmatmul.bf16.gmra.mxu0 %v694_v52 }
  0xbb   :  { %v294_v60 = vpop.f32.mrf.mxu0 }
  0xbc   :  { %v373_v54 = vpop.f32.mrf.mxu1 }
  0xbd   :  { %v374_v59 = vadd.f32 %v373_v54, %v294_v60 }
  0xc3   :  { %v296_v53 = vpop.f32.mrf.mxu0  ;;  %v488_v56 = vpop.f32.mrf.mxu2 }
  0xc4   :  { %v635_v57 = vpop.f32.mrf.mxu3  ;;  %v375_v61 = vpop.f32.mrf.mxu1  ;;  %v498_v34 = vadd.f32 %v488_v56, %v374_v59  ;;  %v2627_v56 = vld [vmem:[%s3437_s3 + $0x58] sm:$0xff] }
  0xc5   :  { %v376_v4 = vadd.f32 %v375_v61, %v296_v53  ;;  %946 = vmatpush.bf16.msrb.mxu1 %v2627_v56  ;;  %v2619_v59 = vld [vmem:[%s3437_s3 + $0x18] sm:$0xff]  ;;  %v2626_v61 = vld [vmem:[%s3437_s3 + $0x50] sm:$0xff] }
  0xc6   :  { %v645_v63 = vadd.f32 %v635_v57, %v498_v34  ;;  %v2637_v57 = vld [vmem:[%s3437_s3 + $0xa8] sm:$0xff]  ;;  %1014 = vmatpush.bf16.msrb.mxu2 %v2619_v59  ;;  %v2636_v34 = vld [vmem:[%s3437_s3 + $0xa0] sm:$0xff] }
  0xc7   :  { %1109 = vmatpush.bf16.msrb.mxu3 %v2637_v57 }
  0xc9   :  { %947 = vmatpush.bf16.msrb.mxu1 %v2626_v61 }
  0xcb   :  { %v299_v55 = vpop.f32.mrf.mxu0  ;;  %v490_v62 = vpop.f32.mrf.mxu2  ;;  %1110 = vmatpush.bf16.msrb.mxu3 %v2636_v34 }
  0xcc   :  { %v637_v1 = vpop.f32.mrf.mxu3  ;;  %v499_v6 = vadd.f32 %v490_v62, %v376_v4  ;;  %v378_v8 = vpop.f32.mrf.mxu1  ;;  %v2645_v62 = vld [vmem:[%s3437_s3 + $0xe8] sm:$0xff] }
  0xcd   :  { %v379_v13 = vadd.f32 %v378_v8, %v299_v55  ;;  %v2617_v4 = vld [vmem:[%s3437_s3 + $0x8] sm:$0xff]  ;;  %v2655_v8 = vld [vmem:[%s3437_s3 + $0x138] sm:$0xff] }
  0xce   :  { %v646_v11 = vadd.f32 %v637_v1, %v499_v6  ;;  %v2635_v1 = vld [vmem:[%s3437_s3 + $0x98] sm:$0xff]  ;;  %v2634_v6 = vld [vmem:[%s3437_s3 + $0x90] sm:$0xff] }
  0xcf   :  { %1111 = vmatpush.bf16.msrb.mxu3 %v2635_v1 }
  0xd3   :  { %v301_v58 = vpop.f32.mrf.mxu0  ;;  %v493_v10 = vpop.f32.mrf.mxu2  ;;  %1112 = vmatpush.bf16.msrb.mxu3 %v2634_v6 }
  0xd4   :  { %v640_v15 = vpop.f32.mrf.mxu3  ;;  %v500_v16 = vadd.f32 %v493_v10, %v379_v13  ;;  %v380_v26 = vpop.f32.mrf.mxu1  ;;  %v2633_v10 = vld [vmem:[%s3437_s3 + $0x88] sm:$0xff]  ;;  %v2632_v13 = vld [vmem:[%s3437_s3 + $0x80] sm:$0xff] }
  0xd5   :  { %v381_v32 = vadd.f32 %v380_v26, %v301_v58  ;;  %v2646_v58 = vld [vmem:[%s3437_s3 + $0xf0] sm:$0xff]  ;;  %v2651_v26 = vld [vmem:[%s3437_s3 + $0x118] sm:$0xff] }
  0xd6   :  { %v647_v29 = vadd.f32 %v640_v15, %v500_v16  ;;  %1231 = vmatpush.bf16.msra.mxu0 %v2646_v58  ;;  %v2653_v15 = vld [vmem:[%s3437_s3 + $0x128] sm:$0xff]  ;;  %v2640_v16 = vld [vmem:[%s3437_s3 + $0xc0] sm:$0xff] }
  0xd7   :  { %1113 = vmatpush.bf16.msrb.mxu3 %v2633_v10 }
  0xda   :  { %1232 = vmatpush.bf16.msra.mxu0 %v2645_v62 }
  0xdb   :  { %v754_v2 = vpop.f32.mrf.mxu0  ;;  %v495_v30 = vpop.f32.mrf.mxu2  ;;  %1114 = vmatpush.bf16.msrb.mxu3 %v2632_v13 }
  0xdc   :  { %v764_v5 = vadd.f32 %v754_v2, %v645_v63  ;;  %v501_v37 = vadd.f32 %v495_v30, %v381_v32  ;;  %v642_v39 = vpop.f32.mrf.mxu3  ;;  %v2618_v63 = vld [vmem:[%s3437_s3 + $0x10] sm:$0xff]  ;;  %v2644_v2 = vld [vmem:[%s3437_s3 + $0xe0] sm:$0xff]  ;;  %v2649_v32 = vld [vmem:[%s3437_s3 + $0x108] sm:$0xff] }
  0xdd   :  { %1015 = vmatpush.bf16.msrb.mxu2 %v2618_v63 }
  0xde   :  { %v772_v7 = vadd.f32 %v2727_v0, %v764_v5  ;;  %v648_v45 = vadd.f32 %v642_v39, %v501_v37  ;;  %1233 = vmatpush.bf16.msra.mxu0 %v2644_v2  ;;  %v2624_v5 = vld [vmem:[%s3437_s3 + $0x40] sm:$0xff] }
  0xe0   :  { %v776_v9 = vmax.f32 %v772_v7, 0.0  ;;  %v2643_v7 = vld [vmem:[%s3437_s3 + $0xd8] sm:$0xff] }
  0xe1   :  { %1016 = vmatpush.bf16.msrb.mxu2 %v2617_v4 }
  0xe2   :  { %780 = vst [vmem:[#allocation2] sm:$0xff] %v776_v9  ;;  %v2616_v9 = vld [vmem:[%s3437_s3] sm:$0xff]  ;;  %1234 = vmatpush.bf16.msra.mxu0 %v2643_v7 }
  0xe3   :  { %v756_v12 = vpop.f32.mrf.mxu0 }
  0xe4   :  { %v765_v14 = vadd.f32 %v756_v12, %v646_v11  ;;  %v2642_v11 = vld [vmem:[%s3437_s3 + $0xd0] sm:$0xff] }
  0xe5   :  { %1017 = vmatpush.bf16.msrb.mxu2 %v2616_v9  ;;  %v2654_v12 = vld [vmem:[%s3437_s3 + $0x130] sm:$0xff] }
  0xe6   :  { %v773_v18 = vadd.f32 %v2727_v0, %v765_v14  ;;  %1235 = vmatpush.bf16.msra.mxu0 %v2642_v11  ;;  %v2641_v14 = vld [vmem:[%s3437_s3 + $0xc8] sm:$0xff] }
  0xe8   :  { %v777_v23 = vmax.f32 %v773_v18, 0.0  ;;  %v2652_v18 = vld [vmem:[%s3437_s3 + $0x120] sm:$0xff] }
  0xea   :  { %781 = vst [vmem:[#allocation2 + $0x8] sm:$0xff] %v777_v23  ;;  %1236 = vmatpush.bf16.msra.mxu0 %v2641_v14 }
  0xeb   :  { %v759_v31 = vpop.f32.mrf.mxu0 }
  0xec   :  { %v766_v33 = vadd.f32 %v759_v31, %v647_v29  ;;  %v2650_v29 = vld [vmem:[%s3437_s3 + $0x110] sm:$0xff] }
  0xee   :  { %v774_v38 = vadd.f32 %v2727_v0, %v766_v33  ;;  %1237 = vmatpush.bf16.msra.mxu0 %v2640_v16  ;;  %v2648_v33 = vld [vmem:[%s3437_s3 + $0x100] sm:$0xff] }
  0xf0   :  { %v778_v41 = vmax.f32 %v774_v38, 0.0 }
  0xf1   :  { %v784_v50 = vld [vmem:[#allocation2] ss:$2 sm:$0xff]  ;;  %v788_v51 = vld [vmem:[#allocation2 + $0x1] ss:$2 sm:$0xff] }
  0xf2   :  { %782 = vst [vmem:[#allocation2 + $0x10] sm:$0xff] %v778_v41  ;;  %v791_v53 = vmax.f32 %v784_v50, %v788_v51 }
  0xf3   :  { %v761_v46 = vpop.f32.mrf.mxu0 }
  0xf4   :  { %v767_v47 = vadd.f32 %v761_v46, %v648_v45 }
  0xf6   :  { %v775_v48 = vadd.f32 %v2727_v0, %v767_v47  ;;  %v2625_v0 = vld [vmem:[%s3437_s3 + $0x48] sm:$0xff]  ;;  %s2945_s3 = smov 112  }
  0xf7   :  { %948 = vmatpush.bf16.msrb.mxu1 %v2625_v0 }
  0xf8   :  { %v779_v49 = vmax.f32 %v775_v48, 0.0 }
  0xfa   :  { %783 = vst [vmem:[#allocation2 + $0x18] sm:$0xff] %v779_v49 }
  0xfb   :  { %949 = vmatpush.bf16.msrb.mxu1 %v2624_v5 }
  0xff   :  { %1329 = vmatpush.bf16.msra.mxu1 %v2655_v8 }
 0x101   :  { %v786_v52 = vld [vmem:[#allocation2 + $0x10] ss:$2 sm:$0xff]  ;;  %v790_v60 = vld [vmem:[#allocation2 + $0x11] ss:$2 sm:$0xff] }
 0x102   :  { %v792_v54 = vmax.f32 %v786_v52, %v790_v60 }
 0x103   :  { %1330 = vmatpush.bf16.msra.mxu1 %v2654_v12 }
 0x104   :  { %v2717_v55 = vpack.i.bf16 %v792_v54, %v791_v53 }
 0x106   :  { %2718 = vrot.lane.b32.xlu0 %v2717_v55, %s2944_s5 }
 0x107   :  { %1331 = vmatpush.bf16.msra.mxu1 %v2653_v15 }
 0x10b   :  { %1332 = vmatpush.bf16.msra.mxu1 %v2652_v18 }
 0x10f   :  { %1333 = vmatpush.bf16.msra.mxu1 %v2651_v26 }
 0x113   :  { %1334 = vmatpush.bf16.msra.mxu1 %v2650_v29 }
 0x117   :  { %1335 = vmatpush.bf16.msra.mxu1 %v2649_v32 }
 0x11b   :  { %1336 = vmatpush.bf16.msra.mxu1 %v2648_v33 }
 0x178   :  { %v2719_v19 = vpop.permute.xlu0 %2718 }
 0x179   :  { %v2721_v20 = vunpack.i.h.bf16 %v2719_v19  ;;  %v2720_v21 = vunpack.i.l.bf16 %v2719_v19 }
 0x17b   :  { %v802_v22 = vmax.f32 %v792_v54, %v2721_v20  ;;  %v801_v23 = vmax.f32 %v791_v53, %v2720_v21 }
 0x17d   :  { %v808_v24 = vpack.c.bf16 %v802_v22, %v802_v22  ;;  %v807_v25 = vpack.c.bf16 %v801_v23, %v801_v23 }
 0x17f   :  { %v813_v27 = vrot.slane %v808_v24, 7  ;;  %v811_v28 = vrot.slane %v807_v25, 7 }
 0x181   :  { %v814_v30 = vrot.slane %v813_v27, 4  ;;  %823 = vst.msk [vmem:[#allocation3 + $0x8] sm:$0xe] %vm819_vm12, %v813_v27  ;;  %v812_v31 = vrot.slane %v811_v28, 4 }
 0x182   :  { %820 = vst.msk [vmem:[#allocation3] sm:$0xe] %vm819_vm12, %v811_v28 }
 0x183   :  { %824 = vst.msk [vmem:[#allocation3 + $0xc] sm:$0x1] %vm821_vm13, %v814_v30 }
 0x184   :  { %822 = vst.msk [vmem:[#allocation3 + $0x4] sm:$0x1] %vm821_vm13, %v812_v31 }
 0x188   :  { %v2615_v35 = vld [vmem:[#allocation3 + $0x4] sm:$0xf0] }
 0x189   :  { %v1025_v36 = vld [vmem:[#allocation3 + $0x8] sm:$0xe]  ;;  %v2197_v38 = vld [vmem:[#allocation3] sm:$0xf] }
 0x18a   :  { %v826_v37 = vld [vmem:[#allocation3 + $0x8] sm:$0xf]  ;;  %v1024_v39 = vld [vmem:[#allocation3] sm:$0xe]  ;;  %v1144_v41 = vshrl.u32 %v1025_v36, 16  ;;  %v2198_v42 = vor.u32 %v2615_v35, %v2197_v38  ;;  %v2232_v45 = vrot.slane %v1025_v36, 9 }
 0x18b   :  { %v844_v43 = vld [vmem:[#allocation3 + $0xc] sm:$0x1]  ;;  %v1126_v46 = vshrl.u32 %v1024_v39, 16  ;;  %v1129_v47 = vshll.u32 %v1024_v39, 16  ;;  %v843_v48 = vld [vmem:[#allocation3 + $0x4] sm:$0x1] }
 0x18c   :  { %v2231_v49 = vrot.slane %v1024_v39, 9  ;;  %v1036_v50 = vrot.slane %v844_v43, 5  ;;  %v1147_v51 = vshll.u32 %v1025_v36, 16  ;;  %v860_v52 = vshrl.u32 %v826_v37, 16  ;;  %1018 = vmatmul.bf16.vlgmr.msrb.gmra.mxu2 %v2198_v42  ;;  %v825_v56 = vld [vmem:[#allocation3] sm:$0xf] }
 0x18d   :  { %v1032_v60 = vrot.slane %v843_v48, 5  ;;  %v1128_v53 = vrot.slane %v1126_v46, 5  ;;  %v1131_v54 = vrot.slane %v1129_v47, 6  ;;  %v1146_v55 = vrot.slane %v1144_v41, 5  ;;  %v1123_v34 = vld [vmem:[#allocation3 + $0x4] sm:$0x3] }
 0x18e   :  { %v1037_v57 = vsel %vm3112_vm6, %v2232_v45, %v1036_v50  ;;  %v846_v58 = vshrl.u32 %v825_v56, 16  ;;  %v849_v59 = vshll.u32 %v825_v56, 16  ;;  %v855_v61 = vshll.u32 %v843_v48, 16  ;;  %v1124_v7 = vld [vmem:[#allocation3 + $0xc] sm:$0x3] }
 0x18f   :  { %v1033_v62 = vsel %vm3112_vm6, %v2231_v49, %v1032_v60  ;;  %v1056_v63 = vunpack.c.l.b16 %v1037_v57  ;;  %v1149_v0 = vrot.slane %v1147_v51, 6  ;;  %v862_v1 = vrot.slane %v860_v52, 4  ;;  %v1247_v45 = vld [vmem:[#allocation3 + $0x8] sm:$0xc] }
 0x190   :  { %v1055_v2 = vunpack.c.l.b16 %v1033_v62  ;;  %v848_v4 = vrot.slane %v846_v58, 4  ;;  %v851_v5 = vrot.slane %v849_v59, 5  ;;  %v863_v6 = vshll.u32 %v826_v37, 16  ;;  %v2671_v58 = vld [vmem:[#allocation10 + $0x78] sm:$0xff] }
 0x191   :  { %v1132_v8 = vor.u32 %v1131_v54, %v1128_v53  ;;  %v1135_v9 = vshrl.u32 %v1123_v34, 16  ;;  %v1138_v10 = vshll.u32 %v1123_v34, 16  ;;  %v869_v14 = vshll.u32 %v844_v43, 16  ;;  %v1246_v43 = vld [vmem:[#allocation3] sm:$0xc]  ;;  %1473 = vmatpush.bf16.msra.mxu2 %v2671_v58 }
 0x192   :  { %v1057_v11 = vpack.c.b16 %v1056_v63, %v1055_v2  ;;  %v852_v12 = vor.u32 %v851_v5, %v848_v4  ;;  %v865_v13 = vrot.slane %v863_v6, 5  ;;  %v1150_v40 = vor.u32 %v1149_v0, %v1146_v55  ;;  %v2663_v59 = vld [vmem:[#allocation10 + $0x38] sm:$0xff]  ;;  %v2670_v63 = vld [vmem:[#allocation10 + $0x70] sm:$0xff] }
 0x193   :  { %v1133_v15 = vrot.slane %v1132_v8, 4  ;;  %v1137_v16 = vrot.slane %v1135_v9, 5  ;;  %v1140_v18 = vrot.slane %v1138_v10, 6  ;;  %v857_v20 = vrot.slane %v855_v61, 5  ;;  %v2679_v61 = vld [vmem:[#allocation10 + $0xb8] sm:$0xff]  ;;  %1538 = vmatpush.bf16.msra.mxu3 %v2663_v59  ;;  %v2686_v2 = vld [vmem:[#allocation10 + $0xf0] sm:$0xff] }
 0x194   :  { %1115 = vmatmul.bf16.vlgmr.msrb.gmra.mxu3 %v1057_v11  ;;  %v853_v19 = vrot.slane %v852_v12, 4  ;;  %v866_v21 = vor.u32 %v865_v13, %v862_v1  ;;  %v1153_v22 = vshrl.u32 %v1124_v7, 16  ;;  %v1156_v24 = vshll.u32 %v1124_v7, 16  ;;  %v2687_v62 = vld [vmem:[#allocation10 + $0xf8] sm:$0xff]  ;;  %1621 = vmatpush.bf16.msrb.mxu0 %v2679_v61  ;;  %v2678_v1 = vld [vmem:[#allocation10 + $0xb0] sm:$0xff]  ;;  %v2669_v10 = vld [vmem:[#allocation10 + $0x68] sm:$0xff] }
 0x195   :  { %v1141_v23 = vor.u32 %v1140_v18, %v1137_v16  ;;  %v871_v27 = vrot.slane %v869_v14, 5  ;;  %v1151_v31 = vrot.slane %v1150_v40, 4  ;;  %v1254_v46 = vrot.slane %v1123_v34, 6  ;;  %v2728_v6 = vld [vmem:[#allocation8] ss:$0 sm:$0xff]  ;;  %1474 = vmatpush.bf16.msra.mxu2 %v2670_v63  ;;  %v2661_v11 = vld [vmem:[#allocation10 + $0x28] sm:$0xff] }
 0x196   :  { %v858_v25 = vsel %vm3118_vm7, %v853_v19, %v857_v20  ;;  %v867_v26 = vrot.slane %v866_v21, 4  ;;  %v1155_v28 = vrot.slane %v1153_v22, 5  ;;  %v1158_v32 = vrot.slane %v1156_v24, 6  ;;  %v2677_v12 = vld [vmem:[#allocation10 + $0xa8] sm:$0xff]  ;;  %v2668_v18 = vld [vmem:[#allocation10 + $0x60] sm:$0xff] }
 0x197   :  { %v890_v29 = vunpack.c.l.b16 %v858_v25  ;;  %v1142_v30 = vsel %vm3157_vm8, %v1133_v15, %v1141_v23  ;;  %v1258_v47 = vrot.slane %v1124_v7, 6  ;;  %v2329_v48 = vrot.slane %v1246_v43, 10  ;;  %1539 = vmatpush.bf16.msra.mxu3 %v2662_v17  ;;  %v2685_v13 = vld [vmem:[#allocation10 + $0xe8] sm:$0xff]  ;;  %v2660_v40 = vld [vmem:[#allocation10 + $0x20] sm:$0xff]  ;;  %v2682_v43 = vld [vmem:[#allocation10 + $0xd0] sm:$0xff] }
 0x198   :  { %v872_v33 = vsel %vm3118_vm7, %v867_v26, %v871_v27  ;;  %v1159_v36 = vor.u32 %v1158_v32, %v1155_v28  ;;  %v1178_v37 = vunpack.c.l.b16 %v1142_v30  ;;  %v2330_v49 = vrot.slane %v1247_v45, 10  ;;  %1622 = vmatpush.bf16.msrb.mxu0 %v2678_v1  ;;  %v2676_v20 = vld [vmem:[#allocation10 + $0xa0] sm:$0xff]  ;;  %v2665_v45 = vld [vmem:[#allocation10 + $0x48] sm:$0xff] }
 0x199   :  { %v891_v35 = vunpack.c.l.b16 %v872_v33  ;;  %v1255_v44 = vsel %vm3248_vm11, %v2329_v48, %v1254_v46  ;;  %1475 = vmatpush.bf16.msra.mxu2 %v2669_v10  ;;  %v2684_v21 = vld [vmem:[#allocation10 + $0xe0] sm:$0xff]  ;;  %v2657_v46 = vld [vmem:[#allocation10 + $0x8] sm:$0xff] }
 0x19a   :  { %v1160_v39 = vsel %vm3157_vm8, %v1151_v31, %v1159_v36  ;;  %v1259_v50 = vsel %vm3248_vm11, %v2330_v49, %v1258_v47  ;;  %v1277_v51 = vunpack.c.l.b16 %v1255_v44  ;;  %v2659_v36 = vld [vmem:[#allocation10 + $0x18] sm:$0xff]  ;;  %v2673_v47 = vld [vmem:[#allocation10 + $0x88] sm:$0xff]  ;;  %v2664_v49 = vld [vmem:[#allocation10 + $0x40] sm:$0xff] }
 0x19b   :  { %v892_v38 = vpack.c.b16 %v891_v35, %v890_v29  ;;  %v1179_v41 = vunpack.c.l.b16 %v1160_v39  ;;  %v1278_v52 = vunpack.c.l.b16 %v1259_v50  ;;  %1540 = vmatpush.bf16.msra.mxu3 %v2661_v11  ;;  %v2667_v35 = vld [vmem:[#allocation10 + $0x58] sm:$0xff]  ;;  %v2666_v39 = vld [vmem:[#allocation10 + $0x50] sm:$0xff]  ;;  %v2681_v48 = vld [vmem:[#allocation10 + $0xc8] sm:$0xff] }
 0x19c   :  { %1623 = vmatpush.bf16.msrb.mxu0 %v2677_v12  ;;  %v2656_v44 = vld [vmem:[#allocation10] sm:$0xff] }
 0x19d   :  { %950 = vmatmul.bf16.vlgmr.msrb.gmra.mxu1 %v892_v38  ;;  %v1180_v42 = vpack.c.b16 %v1179_v41, %v1178_v37  ;;  %v1279_v3 = vpack.c.b16 %v1278_v52, %v1277_v51  ;;  %1476 = vmatpush.bf16.msra.mxu2 %v2668_v18  ;;  %v2675_v37 = vld [vmem:[#allocation10 + $0x98] sm:$0xff]  ;;  %v2658_v41 = vld [vmem:[#allocation10 + $0x10] sm:$0xff]  ;;  %v2672_v50 = vld [vmem:[#allocation10 + $0x80] sm:$0xff] }
 0x19e   :  { %1705 = vmatpush.bf16.msrb.mxu1 %v2687_v62  ;;  %v2683_v38 = vld [vmem:[#allocation10 + $0xd8] sm:$0xff]  ;;  %v2680_v51 = vld [vmem:[#allocation10 + $0xc0] sm:$0xff] }
 0x19f   :  { %1238 = vmatmul.bf16.vlgmr.msra.gmra.mxu0 %v1180_v42  ;;  %1541 = vmatpush.bf16.msra.mxu3 %v2660_v40  ;;  %v2674_v42 = vld [vmem:[#allocation10 + $0x90] sm:$0xff] }
 0x1a0   :  { %1624 = vmatpush.bf16.msrb.mxu0 %v2676_v20  ;;  %v2695_v52 = vld [vmem:[%s3441_s7 + $0x38] sm:$0xff]  ;;  %v2690_v40 = vld [vmem:[%s3441_s7 + $0x10] sm:$0xff]  ;;  %v2688_v20 = vld [vmem:[%s3441_s7] sm:$0xff] }
 0x1a1   :  { %1477 = vmatpush.bf16.msra.mxu2 %v2667_v35  ;;  %v2691_v18 = vld [vmem:[%s3441_s7 + $0x18] sm:$0xff] }
 0x1a2   :  { %1706 = vmatpush.bf16.msrb.mxu1 %v2686_v2 }
 0x1a3   :  { %1542 = vmatpush.bf16.msra.mxu3 %v2659_v36 }
 0x1a4   :  { %1625 = vmatpush.bf16.msrb.mxu0 %v2675_v37 }
 0x1a5   :  { %1478 = vmatpush.bf16.msra.mxu2 %v2666_v39 }
 0x1a6   :  { %1707 = vmatpush.bf16.msrb.mxu1 %v2685_v13 }
 0x1a7   :  { %1543 = vmatpush.bf16.msra.mxu3 %v2658_v41 }
 0x1a8   :  { %1626 = vmatpush.bf16.msrb.mxu0 %v2674_v42 }
 0x1a9   :  { %1479 = vmatpush.bf16.msra.mxu2 %v2665_v45  ;;  %v2697_v45 = vld [vmem:[#allocation14 + $0x8] sm:$0xff] }
 0x1aa   :  { %1708 = vmatpush.bf16.msrb.mxu1 %v2684_v21  ;;  %v2703_v21 = vld [vmem:[#allocation14 + $0x38] sm:$0xff] }
 0x1ab   :  { %1544 = vmatpush.bf16.msra.mxu3 %v2657_v46  ;;  %v2696_v46 = vld [vmem:[#allocation14] sm:$0xff] }
 0x1ac   :  { %1627 = vmatpush.bf16.msrb.mxu0 %v2673_v47  ;;  %v2730_v47 = vld [vmem:[#allocation13] ss:$0 sm:$0xff] }
 0x1ad   :  { %1337 = vmatmul.bf16.vlgmr.msra.gmra.mxu1 %v1279_v3  ;;  %1480 = vmatpush.bf16.msra.mxu2 %v2664_v49  ;;  %v2694_v3 = vld [vmem:[%s3441_s7 + $0x30] sm:$0xff] }
 0x1ae   :  { %1709 = vmatpush.bf16.msrb.mxu1 %v2683_v38 }
 0x1af   :  { %1545 = vmatpush.bf16.msra.mxu3 %v2656_v44 }
 0x1b0   :  { %1628 = vmatpush.bf16.msrb.mxu0 %v2672_v50 }
 0x1b1   :  { %1794 = vmatpush.bf16.msrb.mxu2 %v2695_v52  ;;  %v2731_v52 = vld [vmem:[#allocation16] ss:$0 sm:$0xff] }
 0x1b2   :  { %1710 = vmatpush.bf16.msrb.mxu1 %v2682_v43 }
 0x1b3   :  { %1877 = vmatpush.bf16.msrb.mxu3 %v2703_v21 }
 0x1b5   :  { %1795 = vmatpush.bf16.msrb.mxu2 %v2694_v3 }
 0x1b6   :  { %1711 = vmatpush.bf16.msrb.mxu1 %v2681_v48 }
 0x1ba   :  { %1712 = vmatpush.bf16.msrb.mxu1 %v2680_v51 }
 0x20f   :  { %v1019_v53 = vpop.f32.mrf.mxu2 }
 0x217   :  { %v1116_v54 = vpop.f32.mrf.mxu3  ;;  %v1021_v0 = vpop.f32.mrf.mxu2 }
 0x21a   :  { %v951_v60 = vpop.f32.mrf.mxu1 }
 0x21b   :  { %v1020_v55 = vadd.f32 %v1019_v53, %v951_v60  ;;  %v2693_v60 = vld [vmem:[%s3441_s7 + $0x28] sm:$0xff] }
 0x21c   :  { %v1239_v34 = vpop.f32.mrf.mxu0  ;;  %1796 = vmatpush.bf16.msrb.mxu2 %v2693_v60 }
 0x21d   :  { %v1121_v57 = vadd.f32 %v1116_v54, %v1020_v55 }
 0x21f   :  { %v1244_v5 = vadd.f32 %v1239_v34, %v1121_v57  ;;  %v1118_v7 = vpop.f32.mrf.mxu3 }
 0x222   :  { %v953_v56 = vpop.f32.mrf.mxu1 }
 0x223   :  { %v1022_v4 = vadd.f32 %v1021_v0, %v953_v56 }
 0x224   :  { %v1241_v19 = vpop.f32.mrf.mxu0 }
 0x225   :  { %v1122_v14 = vadd.f32 %v1118_v7, %v1022_v4 }
 0x227   :  { %v1245_v22 = vadd.f32 %v1241_v19, %v1122_v14  ;;  %v2689_v19 = vld [vmem:[%s3441_s7 + $0x8] sm:$0xff] }
 0x22a   :  { %v1338_v8 = vpop.f32.mrf.mxu1 }
 0x22b   :  { %v1343_v9 = vadd.f32 %v1338_v8, %v1244_v5 }
 0x22d   :  { %v1349_v15 = vadd.f32 %v2728_v6, %v1343_v9 }
 0x22f   :  { %v1351_v16 = vmax.f32 %v1349_v15, 0.0 }
 0x231   :  { %1353 = vst [vmem:[#allocation4] sm:$0xff] %v1351_v16  ;;  %v2692_v16 = vld [vmem:[%s3441_s7 + $0x20] sm:$0xff]  ;;  %s2946_s7 = smov [#allocation17]  }
 0x232   :  { %v1340_v23 = vpop.f32.mrf.mxu1  ;;  %1797 = vmatpush.bf16.msrb.mxu2 %v2692_v16  ;;  %s1896_s21 = sshll.u32 %s2946_s7, 4  ;;  %s1897_s21 = int_to_ptr.vmem [resolvable:$true] %s1896_s21 }
 0x233   :  { %v1344_v24 = vadd.f32 %v1340_v23, %v1245_v22  ;;  %v2702_v22 = vld [vmem:[#allocation14 + $0x30] sm:$0xff]  ;;  %v2701_v23 = vld [vmem:[#allocation14 + $0x28] sm:$0xff] }
 0x234   :  { %1878 = vmatpush.bf16.msrb.mxu3 %v2702_v22 }
 0x235   :  { %v1350_v25 = vadd.f32 %v2728_v6, %v1344_v24  ;;  %v2700_v24 = vld [vmem:[#allocation14 + $0x20] sm:$0xff] }
 0x236   :  { %1798 = vmatpush.bf16.msrb.mxu2 %v2691_v18 }
 0x237   :  { %v1352_v26 = vmax.f32 %v1350_v25, 0.0 }
 0x238   :  { %v1355_v27 = vld [vmem:[#allocation4] ss:$2 sm:$0xf]  ;;  %v1359_v28 = vld [vmem:[#allocation4 + $0x1] ss:$2 sm:$0xf]  ;;  %1879 = vmatpush.bf16.msrb.mxu3 %v2701_v23 }
 0x239   :  { %1354 = vst [vmem:[#allocation4 + $0x8] sm:$0xff] %v1352_v26  ;;  %v1362_v31 = vmax.f32 %v1355_v27, %v1359_v28  ;;  %v2699_v27 = vld [vmem:[#allocation14 + $0x18] sm:$0xff]  ;;  %v2698_v28 = vld [vmem:[#allocation14 + $0x10] sm:$0xff] }
 0x23a   :  { %1799 = vmatpush.bf16.msrb.mxu2 %v2690_v40 }
 0x23c   :  { %1880 = vmatpush.bf16.msrb.mxu3 %v2700_v24 }
 0x23e   :  { %1800 = vmatpush.bf16.msrb.mxu2 %v2689_v19 }
 0x240   :  { %v1357_v29 = vld [vmem:[#allocation4 + $0x8] ss:$2 sm:$0xf]  ;;  %v1361_v30 = vld [vmem:[#allocation4 + $0x9] ss:$2 sm:$0xf]  ;;  %1881 = vmatpush.bf16.msrb.mxu3 %v2699_v27 }
 0x241   :  { %v1363_v32 = vmax.f32 %v1357_v29, %v1361_v30 }
 0x242   :  { %1801 = vmatpush.bf16.msrb.mxu2 %v2688_v20 }
 0x243   :  { %v2722_v33 = vpack.i.bf16 %v1363_v32, %v1362_v31 }
 0x244   :  { %1882 = vmatpush.bf16.msrb.mxu3 %v2698_v28 }
 0x245   :  { %2723 = vrot.lane.b32.xlu0 %v2722_v33, %s2945_s3  ;;  %v2729_v33 = vld [vmem:[#allocation11] ss:$0 sm:$0xff] }
 0x248   :  { %1883 = vmatpush.bf16.msrb.mxu3 %v2697_v45 }
 0x24c   :  { %1884 = vmatpush.bf16.msrb.mxu3 %v2696_v46 }
 0x2b7   :  { %v2724_v53 = vpop.permute.xlu0 %2723 }
 0x2b8   :  { %v2726_v54 = vunpack.i.h.bf16 %v2724_v53  ;;  %v2725_v55 = vunpack.i.l.bf16 %v2724_v53 }
 0x2ba   :  { %v1373_v56 = vmax.f32 %v1363_v32, %v2726_v54  ;;  %v1372_v57 = vmax.f32 %v1362_v31, %v2725_v55 }
 0x2bc   :  { %v1376_v58 = vsel %vm1374_vm14, %v1373_v56, 0.0  ;;  %v1375_v59 = vsel %vm1374_vm14, %v1372_v57, 0.0 }
 0x2bd   :  { %v1378_v61 = vpack.c.bf16 %v1376_v58, %v1376_v58  ;;  %v1377_v34 = vpack.c.bf16 %v1375_v59, %v1375_v59 }
 0x2bf   :  { %v1415_v62 = vunpack.c.l.b16 %v1378_v61  ;;  %v1414_v63 = vunpack.c.l.b16 %v1377_v34 }
 0x2c1   :  { %v2380_v17 = vunpack.i.l.s16 %v1415_v62  ;;  %v2379_v0 = vunpack.i.l.s16 %v1414_v63 }
 0x2c3   :  { %v1420_v1 = vrot.slane %v2379_v0, 1  ;;  %v1486_v2 = vrot.slane %v2380_v17, 7  ;;  %v1568_v4 = vrot.slane %v2379_v0, 2  ;;  %v1569_v5 = vrot.slane %v2380_v17, 1 }
 0x2c4   :  { %v1652_v6 = vrot.slane %v2379_v0, 3  ;;  %v1653_v7 = vrot.slane %v2380_v17, 2 }
 0x2c5   :  { %v1422_v8 = vsel %vm1421_vm15, %v2380_v17, %v1420_v1  ;;  %v1487_v9 = vsel %vm1421_vm15, %v1486_v2, %v2379_v0  ;;  %v1570_v10 = vsel %vm1421_vm15, %v1569_v5, %v1568_v4 }
 0x2c6   :  { %v1423_v11 = vpack.c.b16 %v1422_v8, %v1422_v8  ;;  %v1488_v12 = vpack.c.b16 %v1487_v9, %v1487_v9  ;;  %v1571_v13 = vpack.c.b16 %v1570_v10, %v1570_v10  ;;  %v1654_v14 = vsel %vm1421_vm15, %v1653_v7, %v1652_v6 }
 0x2c7   :  { %v1655_v15 = vpack.c.b16 %v1654_v14, %v1654_v14 }
 0x2c8   :  { %1481 = vmatmul.bf16.vlgmr.msra.gmra.mxu2 %v1423_v11  ;;  %1546 = vmatmul.bf16.vlgmr.msra.gmra.mxu3 %v1488_v12 }
 0x2c9   :  { %1629 = vmatmul.bf16.vlgmr.msrb.gmra.mxu0 %v1571_v13  ;;  %1713 = vmatmul.bf16.vlgmr.msrb.gmra.mxu1 %v1655_v15 }
 0x346   :  { %v1630_v25 = vpop.f32.mrf.mxu0  ;;  %v1714_v26 = vpop.f32.mrf.mxu1 }
 0x34b   :  { %v1482_v29 = vpop.f32.mrf.mxu2  ;;  %v1547_v30 = vpop.f32.mrf.mxu3 }
 0x34c   :  { %v1548_v31 = vadd.f32 %v1547_v30, %v1482_v29 }
 0x34e   :  { %v1634_v32 = vadd.f32 %v1630_v25, %v1548_v31  ;;  %v1632_v35 = vpop.f32.mrf.mxu0  ;;  %v1716_v36 = vpop.f32.mrf.mxu1 }
 0x350   :  { %v1718_v37 = vadd.f32 %v1714_v26, %v1634_v32 }
 0x352   :  { %v1723_v38 = vadd.f32 %v2729_v33, %v1718_v37 }
 0x353   :  { %v1484_v39 = vpop.f32.mrf.mxu2  ;;  %v1549_v41 = vpop.f32.mrf.mxu3 }
 0x354   :  { %v1724_v42 = vmax.f32 %v1723_v38, 0.0 }
 0x356   :  { %v1725_v43 = vpack.c.bf16 %v1724_v42, %v1724_v42 }
 0x358   :  { %1802 = vmatmul.bf16.vlgmr.msrb.gmra.mxu2 %v1725_v43 }
 0x3db   :  { %v1803_v48 = vpop.f32.mrf.mxu2 }
 0x3dc   :  { %v1804_v49 = vadd.f32 %v2730_v47, %v1803_v48 }
 0x3de   :  { %v1807_v44 = vmax.f32 %v1804_v49, 0.0 }
 0x3e0   :  { %v1808_v50 = vpack.c.bf16 %v1807_v44, %v1807_v44 }
 0x3e2   :  { %1885 = vmatmul.bf16.vlgmr.msrb.gmra.mxu3 %v1808_v50 }
 0x3e3   :  { %v1805_v51 = vpop.f32.mrf.mxu2 }
 0x465   :  { %v1886_v3 = vpop.f32.mrf.mxu3 }
 0x466   :  { %v1887_v60 = vadd.f32 %v2731_v52, %v1886_v3 }
 0x468   :  { %1890 = vst [vmem:[#allocation17] sm:$0x3] %v1887_v60 }
 0x469   :  { %1901 = dma.vmem_to_hbm [thread:$0]  %s1897_s21, 32, %s1899_s24, [#allocation7]  }
 0x46d   :  { %v1888_v53 = vpop.f32.mrf.mxu3 }
 0x46e   :  { %2932 = dma.done.wait [#allocation7], 32  }
 0x46f   :  { %2933 = vsyncadd [#allocation7], 4294967264 }
 0x470   :  { %1906 = vsyncpa [#allocation6], 1 }
 0x471   :  { %1907 = vsyncpa [#allocation9], 1 }
 0x472   :  { %1908 = vsyncpa [#allocation12], 1 }
 0x473   :  { %1909 = vsyncpa [#allocation15], 1 }
 0x474   :  { %1910 = vsyncpa [#allocation7], 1 }

</bundles_post_ra>
